<compile_context>
chip_gen: v6e
topology: v6e:2x2x1
jax: 0.10.0
libtpu: 0.0.40
codegen_flags: <defaults>
</compile_context>

<pallas_src>
import jax
import jax.numpy as jnp
from jax import lax
from jax.experimental import pallas as pl
from jax.experimental.pallas import tpu as pltpu

# ----------------------------- configuration --------------------------------
IMG_SIZE = 16            # image_encoder.img_size (cube side after padding)
PATCH = 8                # 3D patch size
EMBED_DIM = 32           # ViT embedding dim
OUT_CHANS = 16           # image-embedding channels (transformer dim)
NUM_MASK_TOKENS = 4      # 3 multimask outputs + 1
GRID = IMG_SIZE // PATCH          # 2  -> image embedding spatial size
N_PATCH = GRID ** 3               # 8  patch tokens
PATCH_VOL = PATCH ** 3            # 512
UP_CHANS = OUT_CHANS // 8         # 2  upscaled embedding channels
UP_SPATIAL = GRID * 4             # 8  low-res mask spatial size
UP_VOL = UP_SPATIAL ** 3          # 512
MASK_THRESHOLD = 0.0
FLAT_EMB = N_PATCH * OUT_CHANS    # 128 (one full vreg row)


# ------------------------------ kernel helpers -------------------------------
def _ln(x, g, b, eps=1e-6):
    mu = jnp.mean(x, axis=-1, keepdims=True)
    var = jnp.mean(jnp.square(x - mu), axis=-1, keepdims=True)
    return (x - mu) * lax.rsqrt(var + eps) * g + b


def _softmax_rows(s):
    s = s - jnp.max(s, axis=-1, keepdims=True)
    p = jnp.exp(s)
    return p * pl.reciprocal(jnp.sum(p, axis=-1, keepdims=True), approx=True)


def _bf16(x):
    return x.astype(jnp.bfloat16)


# ------------------------- fused image-encoder kernel -------------------------
def _encoder_kernel(patches_ref, patch_w_ref, patch_b_ref, pos_ref,
                    ln1_g_ref, ln1_b_ref, wqkv_ref,
                    ln2_g_ref, ln2_b_ref, mlp_w1_ref, mlp_b1_ref,
                    mlp_w2_ref, mlp_b2_ref, neck_w_ref, neck_g_ref, neck_b_ref,
                    scat_s_ref, scat_m_ref, out_ref):
    # Patch embedding (normalization is folded into patch_w / patch_b).
    x = _bf16(patches_ref[0])                                    # (8, 512)
    tok = jnp.dot(x, patch_w_ref[...],
                  preferred_element_type=jnp.float32) + patch_b_ref[...]
    tok = tok + pos_ref[...]

    # ViT block: self-attention (wo folded into the V slice of wqkv).
    h = _ln(tok, ln1_g_ref[...], ln1_b_ref[...])
    qkv = jnp.dot(_bf16(h), wqkv_ref[...],
                  preferred_element_type=jnp.float32)             # (8, 96)
    q = qkv[:, :EMBED_DIM]
    k = qkv[:, EMBED_DIM:2 * EMBED_DIM]
    v = qkv[:, 2 * EMBED_DIM:]                                    # already @ wo
    scale = EMBED_DIM ** -0.5
    s = lax.dot_general(_bf16(q), _bf16(k), (((1,), (1,)), ((), ())),
                        preferred_element_type=jnp.float32) * scale
    p = _softmax_rows(s)
    tok = tok + jnp.dot(_bf16(p), _bf16(v),
                        preferred_element_type=jnp.float32)

    # MLP.
    h = _ln(tok, ln2_g_ref[...], ln2_b_ref[...])
    h = jnp.dot(_bf16(h), mlp_w1_ref[...],
                preferred_element_type=jnp.float32) + mlp_b1_ref[...]
    h = jax.nn.gelu(h)
    tok = tok + jnp.dot(_bf16(h), mlp_w2_ref[...],
                        preferred_element_type=jnp.float32) + mlp_b2_ref[...]

    # Neck: 1x1x1 conv (channel matmul) + layernorm.
    emb = jnp.dot(_bf16(tok), neck_w_ref[...],
                  preferred_element_type=jnp.float32)
    emb = _ln(emb, neck_g_ref[...], neck_b_ref[...])              # (8, 16)

    # Lane-dense writeback: scatter the (8,16) embedding into one 128-lane
    # row with an exact 0/1 matmul + sublane reduce (no shape-cast relayout).
    spread = jnp.dot(emb, scat_s_ref[...],
                     preferred_element_type=jnp.float32)          # (8, 128)
    flat = jnp.sum(spread * scat_m_ref[...], axis=0, keepdims=True)  # (1, 128)
    out_ref[0] = flat


# --------------------------- fused mask-decoder kernel -------------------------
def _decoder_kernel(tokens_ref, src_ref, pe_ref, upT_ref,
                    wq_ref, wk_ref, wvo_ref,
                    ln_g_ref, ln_b_ref, mlp_w1_ref, mlp_b1_ref,
                    mlp_w2_ref, mlp_b2_ref,
                    up_wT_ref, up_bT_ref,
                    hyp_w1_ref, hyp_mask_ref, hyp_w2_ref,
                    iou_w1_ref, iou_b1_ref, iou_w2p_ref, iou_b2p_ref,
                    out_ref):
    tokens = tokens_ref[0]                                        # (T, C)
    src = src_ref[0]                                              # (8, C)
    kv_in = src + pe_ref[...]

    # TODO(synk): full TwoWayTransformer not reproduced; single token->image
    # cross-attention block + MLP stands in for it.
    q = jnp.dot(_bf16(tokens), wq_ref[...], preferred_element_type=jnp.float32)
    k = jnp.dot(_bf16(kv_in), wk_ref[...], preferred_element_type=jnp.float32)
    v = jnp.dot(_bf16(src), wvo_ref[...],                         # wv @ wo folded
                preferred_element_type=jnp.float32)
    scale = OUT_CHANS ** -0.5
    s = lax.dot_general(_bf16(q), _bf16(k), (((1,), (1,)), ((), ())),
                        preferred_element_type=jnp.float32) * scale
    a = jnp.dot(_bf16(_softmax_rows(s)), _bf16(v),
                preferred_element_type=jnp.float32)
    tokens = _ln(tokens + a, ln_g_ref[...], ln_b_ref[...])
    h = jnp.dot(_bf16(tokens), mlp_w1_ref[...],
                preferred_element_type=jnp.float32) + mlp_b1_ref[...]
    h = jnp.maximum(h, 0.0)
    tokens = tokens + jnp.dot(_bf16(h), mlp_w2_ref[...],
                              preferred_element_type=jnp.float32) + mlp_b2_ref[...]

    iou_tok = tokens[0:1]                                         # (1, C)
    mask_toks = tokens[1:1 + NUM_MASK_TOKENS]                     # (4, C)

    # Upscaled image features, lane-dense: (UP_CHANS, UP_VOL) = (2, 512).
    up_featT = jnp.dot(up_wT_ref[...], _bf16(upT_ref[0]),
                       preferred_element_type=jnp.float32) + up_bT_ref[...]
    up_featT = jax.nn.gelu(up_featT)

    # Hypernetwork heads as block-column matmuls (no per-token loop/concat).
    h1 = jnp.dot(_bf16(mask_toks), hyp_w1_ref[...],
                 preferred_element_type=jnp.float32)              # (4, 64)
    h1 = jnp.maximum(h1, 0.0) * hyp_mask_ref[...]                 # keep diag blocks
    hyper = jnp.dot(_bf16(h1), hyp_w2_ref[...],
                    preferred_element_type=jnp.float32)           # (4, UP_CHANS)

    # K=2 contraction as VPU FMAs; output stays lane-dense (4, 512).
    masks = hyper[:, 0:1] * up_featT[0:1, :]
    for c in range(1, UP_CHANS):
        masks = masks + hyper[:, c:c + 1] * up_featT[c:c + 1, :]

    # IoU head; iou_w2/iou_b2 are zero-padded to 512 cols on the host, so the
    # result is already one 512-lane row packed next to the masks.
    iou_h = jnp.maximum(jnp.dot(_bf16(iou_tok), iou_w1_ref[...],
                                preferred_element_type=jnp.float32)
                        + iou_b1_ref[...], 0.0)
    iou_row = jnp.dot(_bf16(iou_h), iou_w2p_ref[...],
                      preferred_element_type=jnp.float32) + iou_b2p_ref[...]  # (1, 512)

    out_ref[0, :NUM_MASK_TOKENS, :] = masks
    out_ref[0, NUM_MASK_TOKENS:, :] = iou_row


# ------------------------------ spec helper ------------------------------------
def _fullspec(a):
    zeros = (0,) * a.ndim
    return pl.BlockSpec(a.shape, lambda b, z=zeros: z)


# ------------------------------ parameters ------------------------------------
def init_params(key):
    keys = jax.random.split(key, 32)
    s = 0.02
    n = lambda i, shape: jax.random.normal(keys[i], shape, jnp.float32) * s
    p = {}
    # image encoder (patch-embed ViT3D, 1 block, neck)
    p["patch_w"] = n(0, (PATCH_VOL, EMBED_DIM))
    p["patch_b"] = jnp.zeros((1, EMBED_DIM), jnp.float32)
    p["pos_embed"] = n(1, (N_PATCH, EMBED_DIM))
    p["ln1_g"] = jnp.ones((1, EMBED_DIM)); p["ln1_b"] = jnp.zeros((1, EMBED_DIM))
    p["wqkv"] = n(2, (EMBED_DIM, 3 * EMBED_DIM))
    p["wo"] = n(3, (EMBED_DIM, EMBED_DIM))
    p["ln2_g"] = jnp.ones((1, EMBED_DIM)); p["ln2_b"] = jnp.zeros((1, EMBED_DIM))
    p["mlp_w1"] = n(4, (EMBED_DIM, 4 * EMBED_DIM)); p["mlp_b1"] = jnp.zeros((1, 4 * EMBED_DIM))
    p["mlp_w2"] = n(5, (4 * EMBED_DIM, EMBED_DIM)); p["mlp_b2"] = jnp.zeros((1, EMBED_DIM))
    p["neck_w"] = n(6, (EMBED_DIM, OUT_CHANS))
    p["neck_ln_g"] = jnp.ones((1, OUT_CHANS)); p["neck_ln_b"] = jnp.zeros((1, OUT_CHANS))
    # prompt encoder
    p["pe_gauss"] = jax.random.normal(keys[7], (3, OUT_CHANS // 2), jnp.float32)
    p["point_embed"] = n(8, (2, OUT_CHANS))
    p["no_mask_embed"] = n(9, (1, OUT_CHANS))
    # mask decoder
    p["iou_token"] = n(10, (1, OUT_CHANS))
    p["mask_tokens"] = n(11, (NUM_MASK_TOKENS, OUT_CHANS))
    p["dec_wq"] = n(12, (OUT_CHANS, OUT_CHANS)); p["dec_wk"] = n(13, (OUT_CHANS, OUT_CHANS))
    p["dec_wv"] = n(14, (OUT_CHANS, OUT_CHANS)); p["dec_wo"] = n(15, (OUT_CHANS, OUT_CHANS))
    p["dec_ln_g"] = jnp.ones((1, OUT_CHANS)); p["dec_ln_b"] = jnp.zeros((1, OUT_CHANS))
    p["dec_mlp_w1"] = n(16, (OUT_CHANS, 2 * OUT_CHANS)); p["dec_mlp_b1"] = jnp.zeros((1, 2 * OUT_CHANS))
    p["dec_mlp_w2"] = n(17, (2 * OUT_CHANS, OUT_CHANS)); p["dec_mlp_b2"] = jnp.zeros((1, OUT_CHANS))
    p["up_w"] = n(18, (OUT_CHANS, UP_CHANS)); p["up_b"] = jnp.zeros((1, UP_CHANS))
    p["hyper_w1"] = n(19, (NUM_MASK_TOKENS, OUT_CHANS, OUT_CHANS))
    p["hyper_w2"] = n(20, (NUM_MASK_TOKENS, OUT_CHANS, UP_CHANS))
    p["iou_w1"] = n(21, (OUT_CHANS, OUT_CHANS)); p["iou_b1"] = jnp.zeros((1, OUT_CHANS))
    p["iou_w2"] = n(22, (OUT_CHANS, NUM_MASK_TOKENS)); p["iou_b2"] = jnp.zeros((1, NUM_MASK_TOKENS))
    # pixel normalization buffers
    p["pixel_mean"] = jnp.array([123.675], jnp.float32)
    p["pixel_std"] = jnp.array([58.395], jnp.float32)
    return p


# ------------------------------ weight preparation -----------------------------
def _prep_encoder_weights(params):
    """Fold pixel norm into patch embed, fold wo into V, build bf16 weights."""
    inv_std = 1.0 / params["pixel_std"][0]
    mean = params["pixel_mean"][0]
    patch_w = params["patch_w"] * inv_std
    patch_b = params["patch_b"] - mean * inv_std * jnp.sum(
        params["patch_w"], axis=0, keepdims=True)
    wqkv = jnp.concatenate(
        [params["wqkv"][:, :2 * EMBED_DIM],
         params["wqkv"][:, 2 * EMBED_DIM:] @ params["wo"]], axis=1)
    # Exact 0/1 lane-scatter constants: flat[0, 16*i + c] = emb[i, c].
    m_idx = jnp.arange(FLAT_EMB)[None, :]
    scat_s = (m_idx % OUT_CHANS == jnp.arange(OUT_CHANS)[:, None]).astype(jnp.float32)
    scat_m = (m_idx // OUT_CHANS == jnp.arange(N_PATCH)[:, None]).astype(jnp.float32)
    return [_bf16(patch_w), patch_b, params["pos_embed"],
            params["ln1_g"], params["ln1_b"], _bf16(wqkv),
            params["ln2_g"], params["ln2_b"],
            _bf16(params["mlp_w1"]), params["mlp_b1"],
            _bf16(params["mlp_w2"]), params["mlp_b2"],
            _bf16(params["neck_w"]), params["neck_ln_g"], params["neck_ln_b"],
            scat_s, scat_m]


def _prep_decoder_weights(params):
    wvo = params["dec_wv"] @ params["dec_wo"]
    # Block-column hypernetwork weights + diagonal-block mask.
    w1cat = jnp.transpose(params["hyper_w1"], (1, 0, 2)).reshape(
        OUT_CHANS, NUM_MASK_TOKENS * OUT_CHANS)                   # (16, 64)
    w2stack = params["hyper_w2"].reshape(NUM_MASK_TOKENS * OUT_CHANS, UP_CHANS)  # (64, 2)
    col = jnp.arange(NUM_MASK_TOKENS * OUT_CHANS)[None, :]
    hyp_mask = (col // OUT_CHANS == jnp.arange(NUM_MASK_TOKENS)[:, None]
                ).astype(jnp.float32)                             # (4, 64)
    # Pack the IoU head: pad its output dim to 512 lanes on the host.
    iou_w2p = jnp.zeros((OUT_CHANS, UP_VOL), jnp.float32
                        ).at[:, :NUM_MASK_TOKENS].set(params["iou_w2"])
    iou_b2p = jnp.zeros((1, UP_VOL), jnp.float32
                        ).at[:, :NUM_MASK_TOKENS].set(params["iou_b2"])
    return [_bf16(params["dec_wq"]), _bf16(params["dec_wk"]), _bf16(wvo),
            params["dec_ln_g"], params["dec_ln_b"],
            _bf16(params["dec_mlp_w1"]), params["dec_mlp_b1"],
            _bf16(params["dec_mlp_w2"]), params["dec_mlp_b2"],
            _bf16(params["up_w"].T), params["up_b"].T,            # (2,16), (2,1)
            _bf16(w1cat), hyp_mask, _bf16(w2stack),
            _bf16(params["iou_w1"]), params["iou_b1"],
            _bf16(iou_w2p), iou_b2p]


# ------------------------------ glue (no kernels) -------------------------------
def preprocess_pad(image, pixel_mean_scalar):
    """Pad the raw image cube; normalization is folded into the patch weights
    (padding with pixel_mean matches the reference zero-pad after (x-mean)/std)."""
    C, d, h, w = image.shape            # C == 1 ('L' image format)
    pad = [(0, 0), (0, IMG_SIZE - d), (0, IMG_SIZE - h), (0, IMG_SIZE - w)]
    return jnp.pad(image.astype(jnp.float32), pad, constant_values=pixel_mean_scalar)


def patchify(x):
    """(1, IMG, IMG, IMG) -> (N_PATCH, PATCH_VOL)."""
    img = x[0]
    p = img.reshape(GRID, PATCH, GRID, PATCH, GRID, PATCH)
    return p.transpose(0, 2, 4, 1, 3, 5).reshape(N_PATCH, PATCH_VOL)


def get_dense_pe(params):
    d = (jnp.arange(GRID, dtype=jnp.float32) + 0.5) / GRID
    zz, yy, xx = jnp.meshgrid(d, d, d, indexing="ij")
    coords = jnp.stack([zz, yy, xx], axis=-1).reshape(-1, 3)
    c = 2.0 * coords - 1.0
    proj = 2.0 * jnp.pi * (c @ params["pe_gauss"])
    return jnp.concatenate([jnp.sin(proj), jnp.cos(proj)], axis=-1)   # (N_PATCH, C)


def encode_points(params, coords, labels):
    """Fourier point-prompt embedding (tiny; plain JAX glue)."""
    c = 2.0 * (coords / IMG_SIZE) - 1.0
    proj = 2.0 * jnp.pi * jnp.einsum("bnc,cd->bnd", c, params["pe_gauss"])
    pe = jnp.concatenate([jnp.sin(proj), jnp.cos(proj)], axis=-1)     # (Bp, N, C)
    lbl = jnp.where(labels[..., None] == 1,
                    params["point_embed"][1], params["point_embed"][0])
    return pe + lbl
# TODO(synk): box and mask prompts of PromptEncoder3D are not implemented.


# ------------------------------ pallas_call wrappers ----------------------------
def image_encoder(params, patches):
    """(B, N_PATCH, PATCH_VOL) -> image embeddings (B, N_PATCH, OUT_CHANS)."""
    B = patches.shape[0]
    weights = _prep_encoder_weights(params)
    out = pl.pallas_call(
        _encoder_kernel,
        out_shape=jax.ShapeDtypeStruct((B, 1, FLAT_EMB), jnp.float32),
        grid=(B,),
        in_specs=[pl.BlockSpec((1, N_PATCH, PATCH_VOL), lambda b: (b, 0, 0))]
                 + [_fullspec(w) for w in weights],
        out_specs=pl.BlockSpec((1, 1, FLAT_EMB), lambda b: (b, 0, 0)),
        compiler_params=pltpu.CompilerParams(dimension_semantics=("parallel",)),
    )(patches, *weights)
    return out.reshape(B, N_PATCH, OUT_CHANS)


def mask_decoder_batched(params, tokens, src, pe, upT):
    """One call over ALL (record, prompt-group) pairs.

    tokens: (BTOT, T, C), src/upT gathered per pair, pe shared.
    Returns packed (BTOT, NUM_MASK_TOKENS + 1, UP_VOL): 4 mask rows + 1 IoU row.
    """
    BTOT, T, _ = tokens.shape
    weights = _prep_decoder_weights(params)
    return pl.pallas_call(
        _decoder_kernel,
        out_shape=jax.ShapeDtypeStruct((BTOT, NUM_MASK_TOKENS + 1, UP_VOL),
                                       jnp.float32),
        grid=(BTOT,),
        in_specs=[pl.BlockSpec((1, T, OUT_CHANS), lambda b: (b, 0, 0)),
                  pl.BlockSpec((1, N_PATCH, OUT_CHANS), lambda b: (b, 0, 0)),
                  _fullspec(pe),
                  pl.BlockSpec((1, OUT_CHANS, UP_VOL), lambda b: (b, 0, 0))]
                 + [_fullspec(w) for w in weights],
        out_specs=pl.BlockSpec((1, NUM_MASK_TOKENS + 1, UP_VOL), lambda b: (b, 0, 0)),
        compiler_params=pltpu.CompilerParams(dimension_semantics=("parallel",)),
    )(tokens, src, pe, upT, *weights)


# ------------------------------ jitted core -------------------------------------
@jax.jit
def sam3d_core(params, patches, sparse_all, rec_idx):
    """Encoder + batched decoder for the whole input batch (single compile)."""
    B = patches.shape[0]
    BTOT = sparse_all.shape[0]

    emb_tok = image_encoder(params, patches)                      # (B, 8, 16)
    image_pe = get_dense_pe(params)                               # (8, 16)

    # Dense prompt = broadcast no_mask embedding; also feeds the upscale path.
    src = emb_tok + params["no_mask_embed"][None]                 # (B, 8, 16)
    up = jax.image.resize(
        src.reshape(B, GRID, GRID, GRID, OUT_CHANS),
        (B, UP_SPATIAL, UP_SPATIAL, UP_SPATIAL, OUT_CHANS),
        method="trilinear").reshape(B, UP_VOL, OUT_CHANS)
    upT = jnp.transpose(up, (0, 2, 1))                            # (B, 16, 512) lane-dense

    prefix = jnp.concatenate([params["iou_token"], params["mask_tokens"]], axis=0)
    tokens = jnp.concatenate(
        [jnp.broadcast_to(prefix[None], (BTOT, 1 + NUM_MASK_TOKENS, OUT_CHANS)),
         sparse_all.astype(jnp.float32)], axis=1)                 # (BTOT, T, C)

    packed = mask_decoder_batched(params, tokens, src[rec_idx], image_pe,
                                  upT[rec_idx])
    low_res = packed[:, :NUM_MASK_TOKENS, :].reshape(
        BTOT, NUM_MASK_TOKENS, UP_SPATIAL, UP_SPATIAL, UP_SPATIAL)
    iou = packed[:, NUM_MASK_TOKENS, :NUM_MASK_TOKENS]            # (BTOT, 4)
    return low_res, iou


def postprocess_masks(low_res, input_size, original_size):
    # TODO(synk): PyTorch F.interpolate(mode='bilinear') on 3D volumes is
    # approximated with jax.image.resize trilinear (half-pixel centers).
    Bp, C = low_res.shape[:2]
    m = jax.image.resize(
        low_res, (Bp, C, IMG_SIZE, IMG_SIZE, IMG_SIZE), method="trilinear")
    m = m[..., : input_size[0], : input_size[1], : input_size[2]]
    m = jax.image.resize(m, (Bp, C) + tuple(original_size), method="trilinear")
    return m


# ------------------------------ Sam3D forward ----------------------------------
def sam3d_forward(params, batched_input, multimask_output):
    mean = float(params["pixel_mean"][0])

    # Batched preprocessing + patchify (normalization folded into patch weights).
    patches = jnp.stack(
        [patchify(preprocess_pad(rec["image"], mean)) for rec in batched_input],
        axis=0)

    # Collect sparse prompts for every record (one decoder launch for all).
    sparse_list = []
    for rec in batched_input:
        if "point_coords" in rec:
            sparse_list.append(
                encode_points(params, rec["point_coords"], rec["point_labels"]))
        else:
            sparse_list.append(jnp.zeros((1, 0, OUT_CHANS), jnp.float32))
    max_n = max(s.shape[1] for s in sparse_list)
    # TODO(synk): real PromptEncoder3D pads missing points with a learned
    # not-a-point embedding; zeros are used here when prompt counts differ.
    sparse_all = jnp.concatenate(
        [jnp.pad(s, ((0, 0), (0, max_n - s.shape[1]), (0, 0))) for s in sparse_list],
        axis=0)
    rec_idx = jnp.concatenate(
        [jnp.full((s.shape[0],), i, jnp.int32) for i, s in enumerate(sparse_list)],
        axis=0)

    low_res_all, iou_all = sam3d_core(params, patches, sparse_all, rec_idx)
    if multimask_output:
        low_res_all, iou_all = low_res_all[:, 1:], iou_all[:, 1:]
    else:
        low_res_all, iou_all = low_res_all[:, 0:1], iou_all[:, 0:1]

    outputs, off = [], 0
    for rec, s in zip(batched_input, sparse_list):
        bp = s.shape[0]
        low_res = low_res_all[off:off + bp]
        iou = iou_all[off:off + bp]
        off += bp
        masks = postprocess_masks(low_res, rec["image"].shape[-3:],
                                  rec["original_size"])
        # Threshold is a single fused XLA compare (no extra kernel / HBM passes).
        masks = masks > MASK_THRESHOLD
        outputs.append({
            "masks": masks,
            "iou_predictions": iou,
            "low_res_logits": low_res,
        })
    return outputs


# ---------------------------------- main ---------------------------------------
if __name__ == "__main__":
    key = jax.random.PRNGKey(0)
    pkey, ikey1, ikey2, ckey1, ckey2 = jax.random.split(key, 5)
    params = init_params(pkey)

    img1 = jax.random.uniform(ikey1, (1, 14, 12, 10), minval=0.0, maxval=255.0)
    img2 = jax.random.uniform(ikey2, (1, 16, 16, 16), minval=0.0, maxval=255.0)
    pts1 = jax.random.uniform(ckey1, (1, 2, 3), minval=0.0, maxval=float(IMG_SIZE))
    pts2 = jax.random.uniform(ckey2, (1, 2, 3), minval=0.0, maxval=float(IMG_SIZE))
    lbl1 = jnp.array([[1, 0]], jnp.int32)
    lbl2 = jnp.array([[1, 1]], jnp.int32)

    batched_input = [
        {"image": img1, "original_size": (20, 18, 14),
         "point_coords": pts1, "point_labels": lbl1},
        {"image": img2, "original_size": (16, 16, 16),
         "point_coords": pts2, "point_labels": lbl2},
    ]

    outputs = sam3d_forward(params, batched_input, multimask_output=True)
    for out in outputs:
        jax.block_until_ready(out["masks"])
        jax.block_until_ready(out["iou_predictions"])
        jax.block_until_ready(out["low_res_logits"])

    assert outputs[0]["masks"].shape == (1, 3, 20, 18, 14)
    assert outputs[0]["masks"].dtype == jnp.bool_
    assert outputs[0]["iou_predictions"].shape == (1, 3)
    assert outputs[0]["low_res_logits"].shape == (1, 3, 8, 8, 8)
    assert outputs[1]["masks"].shape == (1, 3, 16, 16, 16)
    print("KERNEL_OK")
</pallas_src>

<mosaic_0001>
module attributes {stable_mosaic.version = 11 : i64} {
  func.func @_encoder_kernel(%arg0: i32, %arg1: memref<1x8x512xf32, #tpu.memory_space<vmem>>, %arg2: memref<512x32xbf16, #tpu.memory_space<vmem>>, %arg3: memref<1x32xf32, #tpu.memory_space<vmem>>, %arg4: memref<8x32xf32, #tpu.memory_space<vmem>>, %arg5: memref<1x32xf32, #tpu.memory_space<vmem>>, %arg6: memref<1x32xf32, #tpu.memory_space<vmem>>, %arg7: memref<32x96xbf16, #tpu.memory_space<vmem>>, %arg8: memref<1x32xf32, #tpu.memory_space<vmem>>, %arg9: memref<1x32xf32, #tpu.memory_space<vmem>>, %arg10: memref<32x128xbf16, #tpu.memory_space<vmem>>, %arg11: memref<1x128xf32, #tpu.memory_space<vmem>>, %arg12: memref<128x32xbf16, #tpu.memory_space<vmem>>, %arg13: memref<1x32xf32, #tpu.memory_space<vmem>>, %arg14: memref<32x16xbf16, #tpu.memory_space<vmem>>, %arg15: memref<1x16xf32, #tpu.memory_space<vmem>>, %arg16: memref<1x16xf32, #tpu.memory_space<vmem>>, %arg17: memref<16x128xf32, #tpu.memory_space<vmem>>, %arg18: memref<8x128xf32, #tpu.memory_space<vmem>>, %arg19: memref<1x1x128xf32, #tpu.memory_space<vmem>>) attributes {dimension_semantics = [#tpu.dimension_semantics<parallel>], iteration_bounds = array<i64: 2>, scalar_prefetch = 0 : i64, scratch_operands = 0 : i64, tpu.core_type = #tpu.core_type<tc>, window_params = [{transform_indices = @transform_0, window_bounds = array<i64: 1, 8, 512>}, {pipeline_mode = #tpu.pipeline_mode<synchronous>, transform_indices = @transform_1, window_bounds = array<i64: 512, 32>}, {pipeline_mode = #tpu.pipeline_mode<synchronous>, transform_indices = @transform_2, window_bounds = array<i64: 1, 32>}, {pipeline_mode = #tpu.pipeline_mode<synchronous>, transform_indices = @transform_3, window_bounds = array<i64: 8, 32>}, {pipeline_mode = #tpu.pipeline_mode<synchronous>, transform_indices = @transform_4, window_bounds = array<i64: 1, 32>}, {pipeline_mode = #tpu.pipeline_mode<synchronous>, transform_indices = @transform_5, window_bounds = array<i64: 1, 32>}, {pipeline_mode = #tpu.pipeline_mode<synchronous>, transform_indices = @transform_6, window_bounds = array<i64: 32, 96>}, {pipeline_mode = #tpu.pipeline_mode<synchronous>, transform_indices = @transform_7, window_bounds = array<i64: 1, 32>}, {pipeline_mode = #tpu.pipeline_mode<synchronous>, transform_indices = @transform_8, window_bounds = array<i64: 1, 32>}, {pipeline_mode = #tpu.pipeline_mode<synchronous>, transform_indices = @transform_9, window_bounds = array<i64: 32, 128>}, {pipeline_mode = #tpu.pipeline_mode<synchronous>, transform_indices = @transform_10, window_bounds = array<i64: 1, 128>}, {pipeline_mode = #tpu.pipeline_mode<synchronous>, transform_indices = @transform_11, window_bounds = array<i64: 128, 32>}, {pipeline_mode = #tpu.pipeline_mode<synchronous>, transform_indices = @transform_12, window_bounds = array<i64: 1, 32>}, {pipeline_mode = #tpu.pipeline_mode<synchronous>, transform_indices = @transform_13, window_bounds = array<i64: 32, 16>}, {pipeline_mode = #tpu.pipeline_mode<synchronous>, transform_indices = @transform_14, window_bounds = array<i64: 1, 16>}, {pipeline_mode = #tpu.pipeline_mode<synchronous>, transform_indices = @transform_15, window_bounds = array<i64: 1, 16>}, {pipeline_mode = #tpu.pipeline_mode<synchronous>, transform_indices = @transform_16, window_bounds = array<i64: 16, 128>}, {pipeline_mode = #tpu.pipeline_mode<synchronous>, transform_indices = @transform_17, window_bounds = array<i64: 8, 128>}, {transform_indices = @transform_18, window_bounds = array<i64: 1, 1, 128>}]} {
    %c0 = arith.constant 0 : index
    %c0_0 = arith.constant 0 : index
    %c0_1 = arith.constant 0 : index
    %0 = vector.load %arg1[%c0, %c0_0, %c0_1] : memref<1x8x512xf32, #tpu.memory_space<vmem>>, vector<1x8x512xf32>
    %1 = vector.shape_cast %0 : vector<1x8x512xf32> to vector<8x512xf32>
    %2 = arith.truncf %1 : vector<8x512xf32> to vector<8x512xbf16>
    %c0_2 = arith.constant 0 : index
    %c0_3 = arith.constant 0 : index
    %3 = vector.load %arg2[%c0_2, %c0_3] : memref<512x32xbf16, #tpu.memory_space<vmem>>, vector<512x32xbf16>
    %cst = arith.constant dense<0.000000e+00> : vector<8x32xf32>
    %4 = tpu.matmul %2, %3, %cst {dimension_numbers = #tpu.dot_dimension_numbers<[1], [0], [0], [1], [0, 0, 1, 1], [], []>} : vector<8x512xbf16>, vector<512x32xbf16>, vector<8x32xf32> -> vector<8x32xf32>
    %c0_4 = arith.constant 0 : index
    %c0_5 = arith.constant 0 : index
    %5 = vector.load %arg3[%c0_4, %c0_5] : memref<1x32xf32, #tpu.memory_space<vmem>>, vector<1x32xf32>
    %6 = vector.broadcast %5 : vector<1x32xf32> to vector<8x32xf32>
    %7 = arith.addf %4, %6 : vector<8x32xf32>
    %c0_6 = arith.constant 0 : index
    %c0_7 = arith.constant 0 : index
    %8 = vector.load %arg4[%c0_6, %c0_7] : memref<8x32xf32, #tpu.memory_space<vmem>>, vector<8x32xf32>
    %9 = arith.addf %7, %8 : vector<8x32xf32>
    %c0_8 = arith.constant 0 : index
    %c0_9 = arith.constant 0 : index
    %10 = vector.load %arg5[%c0_8, %c0_9] : memref<1x32xf32, #tpu.memory_space<vmem>>, vector<1x32xf32>
    %c0_10 = arith.constant 0 : index
    %c0_11 = arith.constant 0 : index
    %11 = vector.load %arg6[%c0_10, %c0_11] : memref<1x32xf32, #tpu.memory_space<vmem>>, vector<1x32xf32>
    %cst_12 = arith.constant dense<0.000000e+00> : vector<8xf32>
    %12 = vector.multi_reduction <add>, %9, %cst_12 [1] : vector<8x32xf32> to vector<8xf32>
    %13 = vector.shape_cast %12 : vector<8xf32> to vector<8x1xf32>
    %cst_13 = arith.constant 3.200000e+01 : f32
    %14 = vector.broadcast %cst_13 : f32 to vector<8x1xf32>
    %15 = arith.divf %13, %14 : vector<8x1xf32>
    %16 = vector.broadcast %15 : vector<8x1xf32> to vector<8x32xf32>
    %17 = arith.subf %9, %16 : vector<8x32xf32>
    %18 = arith.mulf %17, %17 : vector<8x32xf32>
    %cst_14 = arith.constant dense<0.000000e+00> : vector<8xf32>
    %19 = vector.multi_reduction <add>, %18, %cst_14 [1] : vector<8x32xf32> to vector<8xf32>
    %20 = vector.shape_cast %19 : vector<8xf32> to vector<8x1xf32>
    %cst_15 = arith.constant 3.200000e+01 : f32
    %21 = vector.broadcast %cst_15 : f32 to vector<8x1xf32>
    %22 = arith.divf %20, %21 : vector<8x1xf32>
    %23 = vector.broadcast %15 : vector<8x1xf32> to vector<8x32xf32>
    %24 = arith.subf %9, %23 : vector<8x32xf32>
    %cst_16 = arith.constant 9.99999997E-7 : f32
    %25 = vector.broadcast %cst_16 : f32 to vector<8x1xf32>
    %26 = arith.addf %22, %25 : vector<8x1xf32>
    %27 = math.rsqrt %26 : vector<8x1xf32>
    %28 = vector.broadcast %27 : vector<8x1xf32> to vector<8x32xf32>
    %29 = arith.mulf %24, %28 : vector<8x32xf32>
    %30 = vector.broadcast %10 : vector<1x32xf32> to vector<8x32xf32>
    %31 = arith.mulf %29, %30 : vector<8x32xf32>
    %32 = vector.broadcast %11 : vector<1x32xf32> to vector<8x32xf32>
    %33 = arith.addf %31, %32 : vector<8x32xf32>
    %34 = arith.truncf %33 : vector<8x32xf32> to vector<8x32xbf16>
    %c0_17 = arith.constant 0 : index
    %c0_18 = arith.constant 0 : index
    %35 = vector.load %arg7[%c0_17, %c0_18] : memref<32x96xbf16, #tpu.memory_space<vmem>>, vector<32x96xbf16>
    %cst_19 = arith.constant dense<0.000000e+00> : vector<8x96xf32>
    %36 = tpu.matmul %34, %35, %cst_19 {dimension_numbers = #tpu.dot_dimension_numbers<[1], [0], [0], [1], [0, 0, 1, 1], [], []>} : vector<8x32xbf16>, vector<32x96xbf16>, vector<8x96xf32> -> vector<8x96xf32>
    %37 = vector.extract_strided_slice %36 {offsets = [0, 0], sizes = [8, 32], strides = [1, 1]} : vector<8x96xf32> to vector<8x32xf32>
    %38 = vector.extract_strided_slice %36 {offsets = [0, 32], sizes = [8, 32], strides = [1, 1]} : vector<8x96xf32> to vector<8x32xf32>
    %39 = vector.extract_strided_slice %36 {offsets = [0, 64], sizes = [8, 32], strides = [1, 1]} : vector<8x96xf32> to vector<8x32xf32>
    %40 = arith.truncf %37 : vector<8x32xf32> to vector<8x32xbf16>
    %41 = arith.truncf %38 : vector<8x32xf32> to vector<8x32xbf16>
    %cst_20 = arith.constant dense<0.000000e+00> : vector<8x8xf32>
    %42 = tpu.matmul %40, %41, %cst_20 {dimension_numbers = #tpu.dot_dimension_numbers<[1], [1], [0], [0], [0, 0, 1, 0], [], []>} : vector<8x32xbf16>, vector<8x32xbf16>, vector<8x8xf32> -> vector<8x8xf32>
    %cst_21 = arith.constant 0.176776692 : f32
    %43 = vector.broadcast %cst_21 : f32 to vector<8x8xf32>
    %44 = arith.mulf %42, %43 : vector<8x8xf32>
    %cst_22 = arith.constant dense<0xFF800000> : vector<8xf32>
    %45 = vector.multi_reduction <maximumf>, %44, %cst_22 [1] : vector<8x8xf32> to vector<8xf32>
    %46 = vector.shape_cast %45 : vector<8xf32> to vector<8x1xf32>
    %47 = vector.broadcast %46 : vector<8x1xf32> to vector<8x8xf32>
    %48 = arith.subf %44, %47 : vector<8x8xf32>
    %49 = math.exp %48 : vector<8x8xf32>
    %cst_23 = arith.constant dense<0.000000e+00> : vector<8xf32>
    %50 = vector.multi_reduction <add>, %49, %cst_23 [1] : vector<8x8xf32> to vector<8xf32>
    %51 = vector.shape_cast %50 : vector<8xf32> to vector<8x1xf32>
    %52 = tpu.reciprocal %51 {approx = true} : vector<8x1xf32> -> vector<8x1xf32>
    %53 = vector.broadcast %52 : vector<8x1xf32> to vector<8x8xf32>
    %54 = arith.mulf %49, %53 : vector<8x8xf32>
    %55 = arith.truncf %54 : vector<8x8xf32> to vector<8x8xbf16>
    %56 = arith.truncf %39 : vector<8x32xf32> to vector<8x32xbf16>
    %cst_24 = arith.constant dense<0.000000e+00> : vector<8x32xf32>
    %57 = tpu.matmul %55, %56, %cst_24 {dimension_numbers = #tpu.dot_dimension_numbers<[1], [0], [0], [1], [0, 0, 1, 1], [], []>} : vector<8x8xbf16>, vector<8x32xbf16>, vector<8x32xf32> -> vector<8x32xf32>
    %58 = arith.addf %9, %57 : vector<8x32xf32>
    %c0_25 = arith.constant 0 : index
    %c0_26 = arith.constant 0 : index
    %59 = vector.load %arg8[%c0_25, %c0_26] : memref<1x32xf32, #tpu.memory_space<vmem>>, vector<1x32xf32>
    %c0_27 = arith.constant 0 : index
    %c0_28 = arith.constant 0 : index
    %60 = vector.load %arg9[%c0_27, %c0_28] : memref<1x32xf32, #tpu.memory_space<vmem>>, vector<1x32xf32>
    %cst_29 = arith.constant dense<0.000000e+00> : vector<8xf32>
    %61 = vector.multi_reduction <add>, %58, %cst_29 [1] : vector<8x32xf32> to vector<8xf32>
    %62 = vector.shape_cast %61 : vector<8xf32> to vector<8x1xf32>
    %cst_30 = arith.constant 3.200000e+01 : f32
    %63 = vector.broadcast %cst_30 : f32 to vector<8x1xf32>
    %64 = arith.divf %62, %63 : vector<8x1xf32>
    %65 = vector.broadcast %64 : vector<8x1xf32> to vector<8x32xf32>
    %66 = arith.subf %58, %65 : vector<8x32xf32>
    %67 = arith.mulf %66, %66 : vector<8x32xf32>
    %cst_31 = arith.constant dense<0.000000e+00> : vector<8xf32>
    %68 = vector.multi_reduction <add>, %67, %cst_31 [1] : vector<8x32xf32> to vector<8xf32>
    %69 = vector.shape_cast %68 : vector<8xf32> to vector<8x1xf32>
    %cst_32 = arith.constant 3.200000e+01 : f32
    %70 = vector.broadcast %cst_32 : f32 to vector<8x1xf32>
    %71 = arith.divf %69, %70 : vector<8x1xf32>
    %72 = vector.broadcast %64 : vector<8x1xf32> to vector<8x32xf32>
    %73 = arith.subf %58, %72 : vector<8x32xf32>
    %cst_33 = arith.constant 9.99999997E-7 : f32
    %74 = vector.broadcast %cst_33 : f32 to vector<8x1xf32>
    %75 = arith.addf %71, %74 : vector<8x1xf32>
    %76 = math.rsqrt %75 : vector<8x1xf32>
    %77 = vector.broadcast %76 : vector<8x1xf32> to vector<8x32xf32>
    %78 = arith.mulf %73, %77 : vector<8x32xf32>
    %79 = vector.broadcast %59 : vector<1x32xf32> to vector<8x32xf32>
    %80 = arith.mulf %78, %79 : vector<8x32xf32>
    %81 = vector.broadcast %60 : vector<1x32xf32> to vector<8x32xf32>
    %82 = arith.addf %80, %81 : vector<8x32xf32>
    %83 = arith.truncf %82 : vector<8x32xf32> to vector<8x32xbf16>
    %c0_34 = arith.constant 0 : index
    %c0_35 = arith.constant 0 : index
    %84 = vector.load %arg10[%c0_34, %c0_35] : memref<32x128xbf16, #tpu.memory_space<vmem>>, vector<32x128xbf16>
    %cst_36 = arith.constant dense<0.000000e+00> : vector<8x128xf32>
    %85 = tpu.matmul %83, %84, %cst_36 {dimension_numbers = #tpu.dot_dimension_numbers<[1], [0], [0], [1], [0, 0, 1, 1], [], []>} : vector<8x32xbf16>, vector<32x128xbf16>, vector<8x128xf32> -> vector<8x128xf32>
    %c0_37 = arith.constant 0 : index
    %c0_38 = arith.constant 0 : index
    %86 = vector.load %arg11[%c0_37, %c0_38] : memref<1x128xf32, #tpu.memory_space<vmem>>, vector<1x128xf32>
    %87 = vector.broadcast %86 : vector<1x128xf32> to vector<8x128xf32>
    %88 = arith.addf %85, %87 : vector<8x128xf32>
    %89 = arith.mulf %88, %88 : vector<8x128xf32>
    %90 = arith.mulf %88, %89 : vector<8x128xf32>
    %cst_39 = arith.constant 4.471500e-02 : f32
    %91 = vector.broadcast %cst_39 : f32 to vector<8x128xf32>
    %92 = arith.mulf %91, %90 : vector<8x128xf32>
    %93 = arith.addf %88, %92 : vector<8x128xf32>
    %cst_40 = arith.constant 0.797884583 : f32
    %94 = vector.broadcast %cst_40 : f32 to vector<8x128xf32>
    %95 = arith.mulf %94, %93 : vector<8x128xf32>
    %96 = math.tanh %95 : vector<8x128xf32>
    %cst_41 = arith.constant 1.000000e+00 : f32
    %97 = vector.broadcast %cst_41 : f32 to vector<8x128xf32>
    %98 = arith.addf %97, %96 : vector<8x128xf32>
    %cst_42 = arith.constant 5.000000e-01 : f32
    %99 = vector.broadcast %cst_42 : f32 to vector<8x128xf32>
    %100 = arith.mulf %99, %98 : vector<8x128xf32>
    %101 = arith.mulf %88, %100 : vector<8x128xf32>
    %102 = arith.truncf %101 : vector<8x128xf32> to vector<8x128xbf16>
    %c0_43 = arith.constant 0 : index
    %c0_44 = arith.constant 0 : index
    %103 = vector.load %arg12[%c0_43, %c0_44] : memref<128x32xbf16, #tpu.memory_space<vmem>>, vector<128x32xbf16>
    %cst_45 = arith.constant dense<0.000000e+00> : vector<8x32xf32>
    %104 = tpu.matmul %102, %103, %cst_45 {dimension_numbers = #tpu.dot_dimension_numbers<[1], [0], [0], [1], [0, 0, 1, 1], [], []>} : vector<8x128xbf16>, vector<128x32xbf16>, vector<8x32xf32> -> vector<8x32xf32>
    %105 = arith.addf %58, %104 : vector<8x32xf32>
    %c0_46 = arith.constant 0 : index
    %c0_47 = arith.constant 0 : index
    %106 = vector.load %arg13[%c0_46, %c0_47] : memref<1x32xf32, #tpu.memory_space<vmem>>, vector<1x32xf32>
    %107 = vector.broadcast %106 : vector<1x32xf32> to vector<8x32xf32>
    %108 = arith.addf %105, %107 : vector<8x32xf32>
    %109 = arith.truncf %108 : vector<8x32xf32> to vector<8x32xbf16>
    %c0_48 = arith.constant 0 : index
    %c0_49 = arith.constant 0 : index
    %110 = vector.load %arg14[%c0_48, %c0_49] : memref<32x16xbf16, #tpu.memory_space<vmem>>, vector<32x16xbf16>
    %cst_50 = arith.constant dense<0.000000e+00> : vector<8x16xf32>
    %111 = tpu.matmul %109, %110, %cst_50 {dimension_numbers = #tpu.dot_dimension_numbers<[1], [0], [0], [1], [0, 0, 1, 1], [], []>} : vector<8x32xbf16>, vector<32x16xbf16>, vector<8x16xf32> -> vector<8x16xf32>
    %c0_51 = arith.constant 0 : index
    %c0_52 = arith.constant 0 : index
    %112 = vector.load %arg15[%c0_51, %c0_52] : memref<1x16xf32, #tpu.memory_space<vmem>>, vector<1x16xf32>
    %c0_53 = arith.constant 0 : index
    %c0_54 = arith.constant 0 : index
    %113 = vector.load %arg16[%c0_53, %c0_54] : memref<1x16xf32, #tpu.memory_space<vmem>>, vector<1x16xf32>
    %cst_55 = arith.constant dense<0.000000e+00> : vector<8xf32>
    %114 = vector.multi_reduction <add>, %111, %cst_55 [1] : vector<8x16xf32> to vector<8xf32>
    %115 = vector.shape_cast %114 : vector<8xf32> to vector<8x1xf32>
    %cst_56 = arith.constant 1.600000e+01 : f32
    %116 = vector.broadcast %cst_56 : f32 to vector<8x1xf32>
    %117 = arith.divf %115, %116 : vector<8x1xf32>
    %118 = vector.broadcast %117 : vector<8x1xf32> to vector<8x16xf32>
    %119 = arith.subf %111, %118 : vector<8x16xf32>
    %120 = arith.mulf %119, %119 : vector<8x16xf32>
    %cst_57 = arith.constant dense<0.000000e+00> : vector<8xf32>
    %121 = vector.multi_reduction <add>, %120, %cst_57 [1] : vector<8x16xf32> to vector<8xf32>
    %122 = vector.shape_cast %121 : vector<8xf32> to vector<8x1xf32>
    %cst_58 = arith.constant 1.600000e+01 : f32
    %123 = vector.broadcast %cst_58 : f32 to vector<8x1xf32>
    %124 = arith.divf %122, %123 : vector<8x1xf32>
    %125 = vector.broadcast %117 : vector<8x1xf32> to vector<8x16xf32>
    %126 = arith.subf %111, %125 : vector<8x16xf32>
    %cst_59 = arith.constant 9.99999997E-7 : f32
    %127 = vector.broadcast %cst_59 : f32 to vector<8x1xf32>
    %128 = arith.addf %124, %127 : vector<8x1xf32>
    %129 = math.rsqrt %128 : vector<8x1xf32>
    %130 = vector.broadcast %129 : vector<8x1xf32> to vector<8x16xf32>
    %131 = arith.mulf %126, %130 : vector<8x16xf32>
    %132 = vector.broadcast %112 : vector<1x16xf32> to vector<8x16xf32>
    %133 = arith.mulf %131, %132 : vector<8x16xf32>
    %134 = vector.broadcast %113 : vector<1x16xf32> to vector<8x16xf32>
    %135 = arith.addf %133, %134 : vector<8x16xf32>
    %c0_60 = arith.constant 0 : index
    %c0_61 = arith.constant 0 : index
    %136 = vector.load %arg17[%c0_60, %c0_61] : memref<16x128xf32, #tpu.memory_space<vmem>>, vector<16x128xf32>
    %cst_62 = arith.constant dense<0.000000e+00> : vector<8x128xf32>
    %137 = tpu.matmul %135, %136, %cst_62 {dimension_numbers = #tpu.dot_dimension_numbers<[1], [0], [0], [1], [0, 0, 1, 1], [], []>} : vector<8x16xf32>, vector<16x128xf32>, vector<8x128xf32> -> vector<8x128xf32>
    %c0_63 = arith.constant 0 : index
    %c0_64 = arith.constant 0 : index
    %138 = vector.load %arg18[%c0_63, %c0_64] : memref<8x128xf32, #tpu.memory_space<vmem>>, vector<8x128xf32>
    %139 = arith.mulf %137, %138 : vector<8x128xf32>
    %cst_65 = arith.constant dense<0.000000e+00> : vector<128xf32>
    %140 = vector.multi_reduction <add>, %139, %cst_65 [0] : vector<8x128xf32> to vector<128xf32>
    %141 = vector.shape_cast %140 : vector<128xf32> to vector<1x128xf32>
    %c0_66 = arith.constant 0 : index
    %c0_67 = arith.constant 0 : index
    %c0_68 = arith.constant 0 : index
    %142 = vector.load %arg19[%c0_66, %c0_67, %c0_68] : memref<1x1x128xf32, #tpu.memory_space<vmem>>, vector<1x1x128xf32>
    %143 = vector.shape_cast %142 : vector<1x1x128xf32> to vector<1x128xf32>
    %144 = vector.shape_cast %141 : vector<1x128xf32> to vector<1x1x128xf32>
    tpu.vector_store %arg19[%c0_66, %c0_67, %c0_68], %144 {strides = array<i32>} : memref<1x1x128xf32, #tpu.memory_space<vmem>>, vector<1x1x128xf32>,
    return
  }
  func.func @transform_0(%arg0: i32) -> (i32, i32, i32) {
    %c0_i32 = arith.constant 0 : i32
    %c0_i32_0 = arith.constant 0 : i32
    %c0_i32_1 = arith.constant 0 : i32
    return %arg0, %c0_i32, %c0_i32_0 : i32, i32, i32
  }
  func.func @transform_1(%arg0: i32) -> (i32, i32) {
    %c0_i32 = arith.constant 0 : i32
    %c0_i32_0 = arith.constant 0 : i32
    %c0_i32_1 = arith.constant 0 : i32
    return %c0_i32, %c0_i32_0 : i32, i32
  }
  func.func @transform_2(%arg0: i32) -> (i32, i32) {
    %c0_i32 = arith.constant 0 : i32
    %c0_i32_0 = arith.constant 0 : i32
    %c0_i32_1 = arith.constant 0 : i32
    return %c0_i32, %c0_i32_0 : i32, i32
  }
  func.func @transform_3(%arg0: i32) -> (i32, i32) {
    %c0_i32 = arith.constant 0 : i32
    %c0_i32_0 = arith.constant 0 : i32
    %c0_i32_1 = arith.constant 0 : i32
    return %c0_i32, %c0_i32_0 : i32, i32
  }
  func.func @transform_4(%arg0: i32) -> (i32, i32) {
    %c0_i32 = arith.constant 0 : i32
    %c0_i32_0 = arith.constant 0 : i32
    %c0_i32_1 = arith.constant 0 : i32
    return %c0_i32, %c0_i32_0 : i32, i32
  }
  func.func @transform_5(%arg0: i32) -> (i32, i32) {
    %c0_i32 = arith.constant 0 : i32
    %c0_i32_0 = arith.constant 0 : i32
    %c0_i32_1 = arith.constant 0 : i32
    return %c0_i32, %c0_i32_0 : i32, i32
  }
  func.func @transform_6(%arg0: i32) -> (i32, i32) {
    %c0_i32 = arith.constant 0 : i32
    %c0_i32_0 = arith.constant 0 : i32
    %c0_i32_1 = arith.constant 0 : i32
    return %c0_i32, %c0_i32_0 : i32, i32
  }
  func.func @transform_7(%arg0: i32) -> (i32, i32) {
    %c0_i32 = arith.constant 0 : i32
    %c0_i32_0 = arith.constant 0 : i32
    %c0_i32_1 = arith.constant 0 : i32
    return %c0_i32, %c0_i32_0 : i32, i32
  }
  func.func @transform_8(%arg0: i32) -> (i32, i32) {
    %c0_i32 = arith.constant 0 : i32
    %c0_i32_0 = arith.constant 0 : i32
    %c0_i32_1 = arith.constant 0 : i32
    return %c0_i32, %c0_i32_0 : i32, i32
  }
  func.func @transform_9(%arg0: i32) -> (i32, i32) {
    %c0_i32 = arith.constant 0 : i32
    %c0_i32_0 = arith.constant 0 : i32
    %c0_i32_1 = arith.constant 0 : i32
    return %c0_i32, %c0_i32_0 : i32, i32
  }
  func.func @transform_10(%arg0: i32) -> (i32, i32) {
    %c0_i32 = arith.constant 0 : i32
    %c0_i32_0 = arith.constant 0 : i32
    %c0_i32_1 = arith.constant 0 : i32
    return %c0_i32, %c0_i32_0 : i32, i32
  }
  func.func @transform_11(%arg0: i32) -> (i32, i32) {
    %c0_i32 = arith.constant 0 : i32
    %c0_i32_0 = arith.constant 0 : i32
    %c0_i32_1 = arith.constant 0 : i32
    return %c0_i32, %c0_i32_0 : i32, i32
  }
  func.func @transform_12(%arg0: i32) -> (i32, i32) {
    %c0_i32 = arith.constant 0 : i32
    %c0_i32_0 = arith.constant 0 : i32
    %c0_i32_1 = arith.constant 0 : i32
    return %c0_i32, %c0_i32_0 : i32, i32
  }
  func.func @transform_13(%arg0: i32) -> (i32, i32) {
    %c0_i32 = arith.constant 0 : i32
    %c0_i32_0 = arith.constant 0 : i32
    %c0_i32_1 = arith.constant 0 : i32
    return %c0_i32, %c0_i32_0 : i32, i32
  }
  func.func @transform_14(%arg0: i32) -> (i32, i32) {
    %c0_i32 = arith.constant 0 : i32
    %c0_i32_0 = arith.constant 0 : i32
    %c0_i32_1 = arith.constant 0 : i32
    return %c0_i32, %c0_i32_0 : i32, i32
  }
  func.func @transform_15(%arg0: i32) -> (i32, i32) {
    %c0_i32 = arith.constant 0 : i32
    %c0_i32_0 = arith.constant 0 : i32
    %c0_i32_1 = arith.constant 0 : i32
    return %c0_i32, %c0_i32_0 : i32, i32
  }
  func.func @transform_16(%arg0: i32) -> (i32, i32) {
    %c0_i32 = arith.constant 0 : i32
    %c0_i32_0 = arith.constant 0 : i32
    %c0_i32_1 = arith.constant 0 : i32
    return %c0_i32, %c0_i32_0 : i32, i32
  }
  func.func @transform_17(%arg0: i32) -> (i32, i32) {
    %c0_i32 = arith.constant 0 : i32
    %c0_i32_0 = arith.constant 0 : i32
    %c0_i32_1 = arith.constant 0 : i32
    return %c0_i32, %c0_i32_0 : i32, i32
  }
  func.func @transform_18(%arg0: i32) -> (i32, i32, i32) {
    %c0_i32 = arith.constant 0 : i32
    %c0_i32_0 = arith.constant 0 : i32
    %c0_i32_1 = arith.constant 0 : i32
    return %arg0, %c0_i32, %c0_i32_0 : i32, i32, i32
  }
}

module attributes {stable_mosaic.version = 11 : i64} {
  func.func @_decoder_kernel(%arg0: i32, %arg1: memref<1x7x16xf32, #tpu.memory_space<vmem>>, %arg2: memref<1x8x16xf32, #tpu.memory_space<vmem>>, %arg3: memref<8x16xf32, #tpu.memory_space<vmem>>, %arg4: memref<1x16x512xf32, #tpu.memory_space<vmem>>, %arg5: memref<16x16xbf16, #tpu.memory_space<vmem>>, %arg6: memref<16x16xbf16, #tpu.memory_space<vmem>>, %arg7: memref<16x16xbf16, #tpu.memory_space<vmem>>, %arg8: memref<1x16xf32, #tpu.memory_space<vmem>>, %arg9: memref<1x16xf32, #tpu.memory_space<vmem>>, %arg10: memref<16x32xbf16, #tpu.memory_space<vmem>>, %arg11: memref<1x32xf32, #tpu.memory_space<vmem>>, %arg12: memref<32x16xbf16, #tpu.memory_space<vmem>>, %arg13: memref<1x16xf32, #tpu.memory_space<vmem>>, %arg14: memref<2x16xbf16, #tpu.memory_space<vmem>>, %arg15: memref<2x1xf32, #tpu.memory_space<vmem>>, %arg16: memref<16x64xbf16, #tpu.memory_space<vmem>>, %arg17: memref<4x64xf32, #tpu.memory_space<vmem>>, %arg18: memref<64x2xbf16, #tpu.memory_space<vmem>>, %arg19: memref<16x16xbf16, #tpu.memory_space<vmem>>, %arg20: memref<1x16xf32, #tpu.memory_space<vmem>>, %arg21: memref<16x512xbf16, #tpu.memory_space<vmem>>, %arg22: memref<1x512xf32, #tpu.memory_space<vmem>>, %arg23: memref<1x5x512xf32, #tpu.memory_space<vmem>>) attributes {dimension_semantics = [#tpu.dimension_semantics<parallel>], iteration_bounds = array<i64: 2>, scalar_prefetch = 0 : i64, scratch_operands = 0 : i64, tpu.core_type = #tpu.core_type<tc>, window_params = [{transform_indices = @transform_0, window_bounds = array<i64: 1, 7, 16>}, {transform_indices = @transform_1, window_bounds = array<i64: 1, 8, 16>}, {pipeline_mode = #tpu.pipeline_mode<synchronous>, transform_indices = @transform_2, window_bounds = array<i64: 8, 16>}, {transform_indices = @transform_3, window_bounds = array<i64: 1, 16, 512>}, {pipeline_mode = #tpu.pipeline_mode<synchronous>, transform_indices = @transform_4, window_bounds = array<i64: 16, 16>}, {pipeline_mode = #tpu.pipeline_mode<synchronous>, transform_indices = @transform_5, window_bounds = array<i64: 16, 16>}, {pipeline_mode = #tpu.pipeline_mode<synchronous>, transform_indices = @transform_6, window_bounds = array<i64: 16, 16>}, {pipeline_mode = #tpu.pipeline_mode<synchronous>, transform_indices = @transform_7, window_bounds = array<i64: 1, 16>}, {pipeline_mode = #tpu.pipeline_mode<synchronous>, transform_indices = @transform_8, window_bounds = array<i64: 1, 16>}, {pipeline_mode = #tpu.pipeline_mode<synchronous>, transform_indices = @transform_9, window_bounds = array<i64: 16, 32>}, {pipeline_mode = #tpu.pipeline_mode<synchronous>, transform_indices = @transform_10, window_bounds = array<i64: 1, 32>}, {pipeline_mode = #tpu.pipeline_mode<synchronous>, transform_indices = @transform_11, window_bounds = array<i64: 32, 16>}, {pipeline_mode = #tpu.pipeline_mode<synchronous>, transform_indices = @transform_12, window_bounds = array<i64: 1, 16>}, {pipeline_mode = #tpu.pipeline_mode<synchronous>, transform_indices = @transform_13, window_bounds = array<i64: 2, 16>}, {pipeline_mode = #tpu.pipeline_mode<synchronous>, transform_indices = @transform_14, window_bounds = array<i64: 2, 1>}, {pipeline_mode = #tpu.pipeline_mode<synchronous>, transform_indices = @transform_15, window_bounds = array<i64: 16, 64>}, {pipeline_mode = #tpu.pipeline_mode<synchronous>, transform_indices = @transform_16, window_bounds = array<i64: 4, 64>}, {pipeline_mode = #tpu.pipeline_mode<synchronous>, transform_indices = @transform_17, window_bounds = array<i64: 64, 2>}, {pipeline_mode = #tpu.pipeline_mode<synchronous>, transform_indices = @transform_18, window_bounds = array<i64: 16, 16>}, {pipeline_mode = #tpu.pipeline_mode<synchronous>, transform_indices = @transform_19, window_bounds = array<i64: 1, 16>}, {pipeline_mode = #tpu.pipeline_mode<synchronous>, transform_indices = @transform_20, window_bounds = array<i64: 16, 512>}, {pipeline_mode = #tpu.pipeline_mode<synchronous>, transform_indices = @transform_21, window_bounds = array<i64: 1, 512>}, {transform_indices = @transform_22, window_bounds = array<i64: 1, 5, 512>}]} {
    %c0 = arith.constant 0 : index
    %c0_0 = arith.constant 0 : index
    %c0_1 = arith.constant 0 : index
    %0 = vector.load %arg1[%c0, %c0_0, %c0_1] : memref<1x7x16xf32, #tpu.memory_space<vmem>>, vector<1x7x16xf32>
    %1 = vector.shape_cast %0 : vector<1x7x16xf32> to vector<7x16xf32>
    %c0_2 = arith.constant 0 : index
    %c0_3 = arith.constant 0 : index
    %c0_4 = arith.constant 0 : index
    %2 = vector.load %arg2[%c0_2, %c0_3, %c0_4] : memref<1x8x16xf32, #tpu.memory_space<vmem>>, vector<1x8x16xf32>
    %3 = vector.shape_cast %2 : vector<1x8x16xf32> to vector<8x16xf32>
    %c0_5 = arith.constant 0 : index
    %c0_6 = arith.constant 0 : index
    %4 = vector.load %arg3[%c0_5, %c0_6] : memref<8x16xf32, #tpu.memory_space<vmem>>, vector<8x16xf32>
    %5 = arith.addf %3, %4 : vector<8x16xf32>
    %6 = arith.truncf %1 : vector<7x16xf32> to vector<7x16xbf16>
    %c0_7 = arith.constant 0 : index
    %c0_8 = arith.constant 0 : index
    %7 = vector.load %arg5[%c0_7, %c0_8] : memref<16x16xbf16, #tpu.memory_space<vmem>>, vector<16x16xbf16>
    %cst = arith.constant dense<0.000000e+00> : vector<7x16xf32>
    %8 = tpu.matmul %6, %7, %cst {dimension_numbers = #tpu.dot_dimension_numbers<[1], [0], [0], [1], [0, 0, 1, 1], [], []>} : vector<7x16xbf16>, vector<16x16xbf16>, vector<7x16xf32> -> vector<7x16xf32>
    %9 = arith.truncf %5 : vector<8x16xf32> to vector<8x16xbf16>
    %c0_9 = arith.constant 0 : index
    %c0_10 = arith.constant 0 : index
    %10 = vector.load %arg6[%c0_9, %c0_10] : memref<16x16xbf16, #tpu.memory_space<vmem>>, vector<16x16xbf16>
    %cst_11 = arith.constant dense<0.000000e+00> : vector<8x16xf32>
    %11 = tpu.matmul %9, %10, %cst_11 {dimension_numbers = #tpu.dot_dimension_numbers<[1], [0], [0], [1], [0, 0, 1, 1], [], []>} : vector<8x16xbf16>, vector<16x16xbf16>, vector<8x16xf32> -> vector<8x16xf32>
    %12 = arith.truncf %3 : vector<8x16xf32> to vector<8x16xbf16>
    %c0_12 = arith.constant 0 : index
    %c0_13 = arith.constant 0 : index
    %13 = vector.load %arg7[%c0_12, %c0_13] : memref<16x16xbf16, #tpu.memory_space<vmem>>, vector<16x16xbf16>
    %cst_14 = arith.constant dense<0.000000e+00> : vector<8x16xf32>
    %14 = tpu.matmul %12, %13, %cst_14 {dimension_numbers = #tpu.dot_dimension_numbers<[1], [0], [0], [1], [0, 0, 1, 1], [], []>} : vector<8x16xbf16>, vector<16x16xbf16>, vector<8x16xf32> -> vector<8x16xf32>
    %15 = arith.truncf %8 : vector<7x16xf32> to vector<7x16xbf16>
    %16 = arith.truncf %11 : vector<8x16xf32> to vector<8x16xbf16>
    %cst_15 = arith.constant dense<0.000000e+00> : vector<7x8xf32>
    %17 = tpu.matmul %15, %16, %cst_15 {dimension_numbers = #tpu.dot_dimension_numbers<[1], [1], [0], [0], [0, 0, 1, 0], [], []>} : vector<7x16xbf16>, vector<8x16xbf16>, vector<7x8xf32> -> vector<7x8xf32>
    %cst_16 = arith.constant 2.500000e-01 : f32
    %18 = vector.broadcast %cst_16 : f32 to vector<7x8xf32>
    %19 = arith.mulf %17, %18 : vector<7x8xf32>
    %cst_17 = arith.constant dense<0xFF800000> : vector<7xf32>
    %20 = vector.multi_reduction <maximumf>, %19, %cst_17 [1] : vector<7x8xf32> to vector<7xf32>
    %21 = vector.shape_cast %20 : vector<7xf32> to vector<7x1xf32>
    %22 = vector.broadcast %21 : vector<7x1xf32> to vector<7x8xf32>
    %23 = arith.subf %19, %22 : vector<7x8xf32>
    %24 = math.exp %23 : vector<7x8xf32>
    %cst_18 = arith.constant dense<0.000000e+00> : vector<7xf32>
    %25 = vector.multi_reduction <add>, %24, %cst_18 [1] : vector<7x8xf32> to vector<7xf32>
    %26 = vector.shape_cast %25 : vector<7xf32> to vector<7x1xf32>
    %27 = tpu.reciprocal %26 {approx = true} : vector<7x1xf32> -> vector<7x1xf32>
    %28 = vector.broadcast %27 : vector<7x1xf32> to vector<7x8xf32>
    %29 = arith.mulf %24, %28 : vector<7x8xf32>
    %30 = arith.truncf %29 : vector<7x8xf32> to vector<7x8xbf16>
    %31 = arith.truncf %14 : vector<8x16xf32> to vector<8x16xbf16>
    %cst_19 = arith.constant dense<0.000000e+00> : vector<7x16xf32>
    %32 = tpu.matmul %30, %31, %cst_19 {dimension_numbers = #tpu.dot_dimension_numbers<[1], [0], [0], [1], [0, 0, 1, 1], [], []>} : vector<7x8xbf16>, vector<8x16xbf16>, vector<7x16xf32> -> vector<7x16xf32>
    %33 = arith.addf %1, %32 : vector<7x16xf32>
    %c0_20 = arith.constant 0 : index
    %c0_21 = arith.constant 0 : index
    %34 = vector.load %arg8[%c0_20, %c0_21] : memref<1x16xf32, #tpu.memory_space<vmem>>, vector<1x16xf32>
    %c0_22 = arith.constant 0 : index
    %c0_23 = arith.constant 0 : index
    %35 = vector.load %arg9[%c0_22, %c0_23] : memref<1x16xf32, #tpu.memory_space<vmem>>, vector<1x16xf32>
    %cst_24 = arith.constant dense<0.000000e+00> : vector<7xf32>
    %36 = vector.multi_reduction <add>, %33, %cst_24 [1] : vector<7x16xf32> to vector<7xf32>
    %37 = vector.shape_cast %36 : vector<7xf32> to vector<7x1xf32>
    %cst_25 = arith.constant 1.600000e+01 : f32
    %38 = vector.broadcast %cst_25 : f32 to vector<7x1xf32>
    %39 = arith.divf %37, %38 : vector<7x1xf32>
    %40 = vector.broadcast %39 : vector<7x1xf32> to vector<7x16xf32>
    %41 = arith.subf %33, %40 : vector<7x16xf32>
    %42 = arith.mulf %41, %41 : vector<7x16xf32>
    %cst_26 = arith.constant dense<0.000000e+00> : vector<7xf32>
    %43 = vector.multi_reduction <add>, %42, %cst_26 [1] : vector<7x16xf32> to vector<7xf32>
    %44 = vector.shape_cast %43 : vector<7xf32> to vector<7x1xf32>
    %cst_27 = arith.constant 1.600000e+01 : f32
    %45 = vector.broadcast %cst_27 : f32 to vector<7x1xf32>
    %46 = arith.divf %44, %45 : vector<7x1xf32>
    %47 = vector.broadcast %39 : vector<7x1xf32> to vector<7x16xf32>
    %48 = arith.subf %33, %47 : vector<7x16xf32>
    %cst_28 = arith.constant 9.99999997E-7 : f32
    %49 = vector.broadcast %cst_28 : f32 to vector<7x1xf32>
    %50 = arith.addf %46, %49 : vector<7x1xf32>
    %51 = math.rsqrt %50 : vector<7x1xf32>
    %52 = vector.broadcast %51 : vector<7x1xf32> to vector<7x16xf32>
    %53 = arith.mulf %48, %52 : vector<7x16xf32>
    %54 = vector.broadcast %34 : vector<1x16xf32> to vector<7x16xf32>
    %55 = arith.mulf %53, %54 : vector<7x16xf32>
    %56 = vector.broadcast %35 : vector<1x16xf32> to vector<7x16xf32>
    %57 = arith.addf %55, %56 : vector<7x16xf32>
    %58 = arith.truncf %57 : vector<7x16xf32> to vector<7x16xbf16>
    %c0_29 = arith.constant 0 : index
    %c0_30 = arith.constant 0 : index
    %59 = vector.load %arg10[%c0_29, %c0_30] : memref<16x32xbf16, #tpu.memory_space<vmem>>, vector<16x32xbf16>
    %cst_31 = arith.constant dense<0.000000e+00> : vector<7x32xf32>
    %60 = tpu.matmul %58, %59, %cst_31 {dimension_numbers = #tpu.dot_dimension_numbers<[1], [0], [0], [1], [0, 0, 1, 1], [], []>} : vector<7x16xbf16>, vector<16x32xbf16>, vector<7x32xf32> -> vector<7x32xf32>
    %c0_32 = arith.constant 0 : index
    %c0_33 = arith.constant 0 : index
    %61 = vector.load %arg11[%c0_32, %c0_33] : memref<1x32xf32, #tpu.memory_space<vmem>>, vector<1x32xf32>
    %62 = vector.broadcast %61 : vector<1x32xf32> to vector<7x32xf32>
    %63 = arith.addf %60, %62 : vector<7x32xf32>
    %cst_34 = arith.constant 0.000000e+00 : f32
    %64 = vector.broadcast %cst_34 : f32 to vector<7x32xf32>
    %65 = arith.maximumf %63, %64 : vector<7x32xf32>
    %66 = arith.truncf %65 : vector<7x32xf32> to vector<7x32xbf16>
    %c0_35 = arith.constant 0 : index
    %c0_36 = arith.constant 0 : index
    %67 = vector.load %arg12[%c0_35, %c0_36] : memref<32x16xbf16, #tpu.memory_space<vmem>>, vector<32x16xbf16>
    %cst_37 = arith.constant dense<0.000000e+00> : vector<7x16xf32>
    %68 = tpu.matmul %66, %67, %cst_37 {dimension_numbers = #tpu.dot_dimension_numbers<[1], [0], [0], [1], [0, 0, 1, 1], [], []>} : vector<7x32xbf16>, vector<32x16xbf16>, vector<7x16xf32> -> vector<7x16xf32>
    %69 = arith.addf %57, %68 : vector<7x16xf32>
    %c0_38 = arith.constant 0 : index
    %c0_39 = arith.constant 0 : index
    %70 = vector.load %arg13[%c0_38, %c0_39] : memref<1x16xf32, #tpu.memory_space<vmem>>, vector<1x16xf32>
    %71 = vector.broadcast %70 : vector<1x16xf32> to vector<7x16xf32>
    %72 = arith.addf %69, %71 : vector<7x16xf32>
    %73 = vector.extract_strided_slice %72 {offsets = [0, 0], sizes = [1, 16], strides = [1, 1]} : vector<7x16xf32> to vector<1x16xf32>
    %74 = vector.extract_strided_slice %72 {offsets = [1, 0], sizes = [4, 16], strides = [1, 1]} : vector<7x16xf32> to vector<4x16xf32>
    %c0_40 = arith.constant 0 : index
    %c0_41 = arith.constant 0 : index
    %75 = vector.load %arg14[%c0_40, %c0_41] : memref<2x16xbf16, #tpu.memory_space<vmem>>, vector<2x16xbf16>
    %c0_42 = arith.constant 0 : index
    %c0_43 = arith.constant 0 : index
    %c0_44 = arith.constant 0 : index
    %76 = vector.load %arg4[%c0_42, %c0_43, %c0_44] : memref<1x16x512xf32, #tpu.memory_space<vmem>>, vector<1x16x512xf32>
    %77 = vector.shape_cast %76 : vector<1x16x512xf32> to vector<16x512xf32>
    %78 = arith.truncf %77 : vector<16x512xf32> to vector<16x512xbf16>
    %cst_45 = arith.constant dense<0.000000e+00> : vector<2x512xf32>
    %79 = tpu.matmul %75, %78, %cst_45 {dimension_numbers = #tpu.dot_dimension_numbers<[1], [0], [0], [1], [0, 0, 1, 1], [], []>} : vector<2x16xbf16>, vector<16x512xbf16>, vector<2x512xf32> -> vector<2x512xf32>
    %c0_46 = arith.constant 0 : index
    %c0_47 = arith.constant 0 : index
    %80 = vector.load %arg15[%c0_46, %c0_47] : memref<2x1xf32, #tpu.memory_space<vmem>>, vector<2x1xf32>
    %81 = vector.broadcast %80 : vector<2x1xf32> to vector<2x512xf32>
    %82 = arith.addf %79, %81 : vector<2x512xf32>
    %83 = arith.mulf %82, %82 : vector<2x512xf32>
    %84 = arith.mulf %82, %83 : vector<2x512xf32>
    %cst_48 = arith.constant 4.471500e-02 : f32
    %85 = vector.broadcast %cst_48 : f32 to vector<2x512xf32>
    %86 = arith.mulf %85, %84 : vector<2x512xf32>
    %87 = arith.addf %82, %86 : vector<2x512xf32>
    %cst_49 = arith.constant 0.797884583 : f32
    %88 = vector.broadcast %cst_49 : f32 to vector<2x512xf32>
    %89 = arith.mulf %88, %87 : vector<2x512xf32>
    %90 = math.tanh %89 : vector<2x512xf32>
    %cst_50 = arith.constant 1.000000e+00 : f32
    %91 = vector.broadcast %cst_50 : f32 to vector<2x512xf32>
    %92 = arith.addf %91, %90 : vector<2x512xf32>
    %cst_51 = arith.constant 5.000000e-01 : f32
    %93 = vector.broadcast %cst_51 : f32 to vector<2x512xf32>
    %94 = arith.mulf %93, %92 : vector<2x512xf32>
    %95 = arith.mulf %82, %94 : vector<2x512xf32>
    %96 = arith.truncf %74 : vector<4x16xf32> to vector<4x16xbf16>
    %c0_52 = arith.constant 0 : index
    %c0_53 = arith.constant 0 : index
    %97 = vector.load %arg16[%c0_52, %c0_53] : memref<16x64xbf16, #tpu.memory_space<vmem>>, vector<16x64xbf16>
    %cst_54 = arith.constant dense<0.000000e+00> : vector<4x64xf32>
    %98 = tpu.matmul %96, %97, %cst_54 {dimension_numbers = #tpu.dot_dimension_numbers<[1], [0], [0], [1], [0, 0, 1, 1], [], []>} : vector<4x16xbf16>, vector<16x64xbf16>, vector<4x64xf32> -> vector<4x64xf32>
    %cst_55 = arith.constant 0.000000e+00 : f32
    %99 = vector.broadcast %cst_55 : f32 to vector<4x64xf32>
    %100 = arith.maximumf %98, %99 : vector<4x64xf32>
    %c0_56 = arith.constant 0 : index
    %c0_57 = arith.constant 0 : index
    %101 = vector.load %arg17[%c0_56, %c0_57] : memref<4x64xf32, #tpu.memory_space<vmem>>, vector<4x64xf32>
    %102 = arith.mulf %100, %101 : vector<4x64xf32>
    %103 = arith.truncf %102 : vector<4x64xf32> to vector<4x64xbf16>
    %c0_58 = arith.constant 0 : index
    %c0_59 = arith.constant 0 : index
    %104 = vector.load %arg18[%c0_58, %c0_59] : memref<64x2xbf16, #tpu.memory_space<vmem>>, vector<64x2xbf16>
    %cst_60 = arith.constant dense<0.000000e+00> : vector<4x2xf32>
    %105 = tpu.matmul %103, %104, %cst_60 {dimension_numbers = #tpu.dot_dimension_numbers<[1], [0], [0], [1], [0, 0, 1, 1], [], []>} : vector<4x64xbf16>, vector<64x2xbf16>, vector<4x2xf32> -> vector<4x2xf32>
    %106 = vector.extract_strided_slice %105 {offsets = [0, 0], sizes = [4, 1], strides = [1, 1]} : vector<4x2xf32> to vector<4x1xf32>
    %107 = vector.extract_strided_slice %95 {offsets = [0, 0], sizes = [1, 512], strides = [1, 1]} : vector<2x512xf32> to vector<1x512xf32>
    %108 = vector.broadcast %106 : vector<4x1xf32> to vector<4x512xf32>
    %109 = vector.broadcast %107 : vector<1x512xf32> to vector<4x512xf32>
    %110 = arith.mulf %108, %109 : vector<4x512xf32>
    %111 = vector.extract_strided_slice %105 {offsets = [0, 1], sizes = [4, 1], strides = [1, 1]} : vector<4x2xf32> to vector<4x1xf32>
    %112 = vector.extract_strided_slice %95 {offsets = [1, 0], sizes = [1, 512], strides = [1, 1]} : vector<2x512xf32> to vector<1x512xf32>
    %113 = vector.broadcast %111 : vector<4x1xf32> to vector<4x512xf32>
    %114 = vector.broadcast %112 : vector<1x512xf32> to vector<4x512xf32>
    %115 = arith.mulf %113, %114 : vector<4x512xf32>
    %116 = arith.addf %110, %115 : vector<4x512xf32>
    %117 = arith.truncf %73 : vector<1x16xf32> to vector<1x16xbf16>
    %c0_61 = arith.constant 0 : index
    %c0_62 = arith.constant 0 : index
    %118 = vector.load %arg19[%c0_61, %c0_62] : memref<16x16xbf16, #tpu.memory_space<vmem>>, vector<16x16xbf16>
    %cst_63 = arith.constant dense<0.000000e+00> : vector<1x16xf32>
    %119 = tpu.matmul %117, %118, %cst_63 {dimension_numbers = #tpu.dot_dimension_numbers<[1], [0], [0], [1], [0, 0, 1, 1], [], []>} : vector<1x16xbf16>, vector<16x16xbf16>, vector<1x16xf32> -> vector<1x16xf32>
    %c0_64 = arith.constant 0 : index
    %c0_65 = arith.constant 0 : index
    %120 = vector.load %arg20[%c0_64, %c0_65] : memref<1x16xf32, #tpu.memory_space<vmem>>, vector<1x16xf32>
    %121 = arith.addf %119, %120 : vector<1x16xf32>
    %cst_66 = arith.constant 0.000000e+00 : f32
    %122 = vector.broadcast %cst_66 : f32 to vector<1x16xf32>
    %123 = arith.maximumf %121, %122 : vector<1x16xf32>
    %124 = arith.truncf %123 : vector<1x16xf32> to vector<1x16xbf16>
    %c0_67 = arith.constant 0 : index
    %c0_68 = arith.constant 0 : index
    %125 = vector.load %arg21[%c0_67, %c0_68] : memref<16x512xbf16, #tpu.memory_space<vmem>>, vector<16x512xbf16>
    %cst_69 = arith.constant dense<0.000000e+00> : vector<1x512xf32>
    %126 = tpu.matmul %124, %125, %cst_69 {dimension_numbers = #tpu.dot_dimension_numbers<[1], [0], [0], [1], [0, 0, 1, 1], [], []>} : vector<1x16xbf16>, vector<16x512xbf16>, vector<1x512xf32> -> vector<1x512xf32>
    %c0_70 = arith.constant 0 : index
    %c0_71 = arith.constant 0 : index
    %127 = vector.load %arg22[%c0_70, %c0_71] : memref<1x512xf32, #tpu.memory_space<vmem>>, vector<1x512xf32>
    %128 = arith.addf %126, %127 : vector<1x512xf32>
    %c0_72 = arith.constant 0 : index
    %c0_73 = arith.constant 0 : index
    %c0_74 = arith.constant 0 : index
    %129 = vector.load %arg23[%c0_72, %c0_73, %c0_74] : memref<1x5x512xf32, #tpu.memory_space<vmem>>, vector<1x4x512xf32>
    %130 = vector.shape_cast %129 : vector<1x4x512xf32> to vector<4x512xf32>
    %131 = vector.shape_cast %116 : vector<4x512xf32> to vector<1x4x512xf32>
    tpu.vector_store %arg23[%c0_72, %c0_73, %c0_74], %131 {strides = array<i32>} : memref<1x5x512xf32, #tpu.memory_space<vmem>>, vector<1x4x512xf32>,
    %c0_75 = arith.constant 0 : index
    %c4 = arith.constant 4 : index
    %c0_76 = arith.constant 0 : index
    %132 = vector.load %arg23[%c0_75, %c4, %c0_76] : memref<1x5x512xf32, #tpu.memory_space<vmem>>, vector<1x1x512xf32>
    %133 = vector.shape_cast %132 : vector<1x1x512xf32> to vector<1x512xf32>
    %134 = vector.shape_cast %128 : vector<1x512xf32> to vector<1x1x512xf32>
    tpu.vector_store %arg23[%c0_75, %c4, %c0_76], %134 {strides = array<i32>} : memref<1x5x512xf32, #tpu.memory_space<vmem>>, vector<1x1x512xf32>,
    return
  }
  func.func @transform_0(%arg0: i32) -> (i32, i32, i32) {
    %c0_i32 = arith.constant 0 : i32
    %c0_i32_0 = arith.constant 0 : i32
    %c0_i32_1 = arith.constant 0 : i32
    return %arg0, %c0_i32, %c0_i32_0 : i32, i32, i32
  }
  func.func @transform_1(%arg0: i32) -> (i32, i32, i32) {
    %c0_i32 = arith.constant 0 : i32
    %c0_i32_0 = arith.constant 0 : i32
    %c0_i32_1 = arith.constant 0 : i32
    return %arg0, %c0_i32, %c0_i32_0 : i32, i32, i32
  }
  func.func @transform_2(%arg0: i32) -> (i32, i32) {
    %c0_i32 = arith.constant 0 : i32
    %c0_i32_0 = arith.constant 0 : i32
    %c0_i32_1 = arith.constant 0 : i32
    return %c0_i32, %c0_i32_0 : i32, i32
  }
  func.func @transform_3(%arg0: i32) -> (i32, i32, i32) {
    %c0_i32 = arith.constant 0 : i32
    %c0_i32_0 = arith.constant 0 : i32
    %c0_i32_1 = arith.constant 0 : i32
    return %arg0, %c0_i32, %c0_i32_0 : i32, i32, i32
  }
  func.func @transform_4(%arg0: i32) -> (i32, i32) {
    %c0_i32 = arith.constant 0 : i32
    %c0_i32_0 = arith.constant 0 : i32
    %c0_i32_1 = arith.constant 0 : i32
    return %c0_i32, %c0_i32_0 : i32, i32
  }
  func.func @transform_5(%arg0: i32) -> (i32, i32) {
    %c0_i32 = arith.constant 0 : i32
    %c0_i32_0 = arith.constant 0 : i32
    %c0_i32_1 = arith.constant 0 : i32
    return %c0_i32, %c0_i32_0 : i32, i32
  }
  func.func @transform_6(%arg0: i32) -> (i32, i32) {
    %c0_i32 = arith.constant 0 : i32
    %c0_i32_0 = arith.constant 0 : i32
    %c0_i32_1 = arith.constant 0 : i32
    return %c0_i32, %c0_i32_0 : i32, i32
  }
  func.func @transform_7(%arg0: i32) -> (i32, i32) {
    %c0_i32 = arith.constant 0 : i32
    %c0_i32_0 = arith.constant 0 : i32
    %c0_i32_1 = arith.constant 0 : i32
    return %c0_i32, %c0_i32_0 : i32, i32
  }
  func.func @transform_8(%arg0: i32) -> (i32, i32) {
    %c0_i32 = arith.constant 0 : i32
    %c0_i32_0 = arith.constant 0 : i32
    %c0_i32_1 = arith.constant 0 : i32
    return %c0_i32, %c0_i32_0 : i32, i32
  }
  func.func @transform_9(%arg0: i32) -> (i32, i32) {
    %c0_i32 = arith.constant 0 : i32
    %c0_i32_0 = arith.constant 0 : i32
    %c0_i32_1 = arith.constant 0 : i32
    return %c0_i32, %c0_i32_0 : i32, i32
  }
  func.func @transform_10(%arg0: i32) -> (i32, i32) {
    %c0_i32 = arith.constant 0 : i32
    %c0_i32_0 = arith.constant 0 : i32
    %c0_i32_1 = arith.constant 0 : i32
    return %c0_i32, %c0_i32_0 : i32, i32
  }
  func.func @transform_11(%arg0: i32) -> (i32, i32) {
    %c0_i32 = arith.constant 0 : i32
    %c0_i32_0 = arith.constant 0 : i32
    %c0_i32_1 = arith.constant 0 : i32
    return %c0_i32, %c0_i32_0 : i32, i32
  }
  func.func @transform_12(%arg0: i32) -> (i32, i32) {
    %c0_i32 = arith.constant 0 : i32
    %c0_i32_0 = arith.constant 0 : i32
    %c0_i32_1 = arith.constant 0 : i32
    return %c0_i32, %c0_i32_0 : i32, i32
  }
  func.func @transform_13(%arg0: i32) -> (i32, i32) {
    %c0_i32 = arith.constant 0 : i32
    %c0_i32_0 = arith.constant 0 : i32
    %c0_i32_1 = arith.constant 0 : i32
    return %c0_i32, %c0_i32_0 : i32, i32
  }
  func.func @transform_14(%arg0: i32) -> (i32, i32) {
    %c0_i32 = arith.constant 0 : i32
    %c0_i32_0 = arith.constant 0 : i32
    %c0_i32_1 = arith.constant 0 : i32
    return %c0_i32, %c0_i32_0 : i32, i32
  }
  func.func @transform_15(%arg0: i32) -> (i32, i32) {
    %c0_i32 = arith.constant 0 : i32
    %c0_i32_0 = arith.constant 0 : i32
    %c0_i32_1 = arith.constant 0 : i32
    return %c0_i32, %c0_i32_0 : i32, i32
  }
  func.func @transform_16(%arg0: i32) -> (i32, i32) {
    %c0_i32 = arith.constant 0 : i32
    %c0_i32_0 = arith.constant 0 : i32
    %c0_i32_1 = arith.constant 0 : i32
    return %c0_i32, %c0_i32_0 : i32, i32
  }
  func.func @transform_17(%arg0: i32) -> (i32, i32) {
    %c0_i32 = arith.constant 0 : i32
    %c0_i32_0 = arith.constant 0 : i32
    %c0_i32_1 = arith.constant 0 : i32
    return %c0_i32, %c0_i32_0 : i32, i32
  }
  func.func @transform_18(%arg0: i32) -> (i32, i32) {
    %c0_i32 = arith.constant 0 : i32
    %c0_i32_0 = arith.constant 0 : i32
    %c0_i32_1 = arith.constant 0 : i32
    return %c0_i32, %c0_i32_0 : i32, i32
  }
  func.func @transform_19(%arg0: i32) -> (i32, i32) {
    %c0_i32 = arith.constant 0 : i32
    %c0_i32_0 = arith.constant 0 : i32
    %c0_i32_1 = arith.constant 0 : i32
    return %c0_i32, %c0_i32_0 : i32, i32
  }
  func.func @transform_20(%arg0: i32) -> (i32, i32) {
    %c0_i32 = arith.constant 0 : i32
    %c0_i32_0 = arith.constant 0 : i32
    %c0_i32_1 = arith.constant 0 : i32
    return %c0_i32, %c0_i32_0 : i32, i32
  }
  func.func @transform_21(%arg0: i32) -> (i32, i32) {
    %c0_i32 = arith.constant 0 : i32
    %c0_i32_0 = arith.constant 0 : i32
    %c0_i32_1 = arith.constant 0 : i32
    return %c0_i32, %c0_i32_0 : i32, i32
  }
  func.func @transform_22(%arg0: i32) -> (i32, i32, i32) {
    %c0_i32 = arith.constant 0 : i32
    %c0_i32_0 = arith.constant 0 : i32
    %c0_i32_1 = arith.constant 0 : i32
    return %arg0, %c0_i32, %c0_i32_0 : i32, i32, i32
  }
}

</mosaic_0001>

<bundles_post_ra>
// kernel: sam3d_core.2
= control target key start
LH: loop header
LB: loop body
LE: loop exit
PB: predicated region body
PF: predicated region fallthrough
CT: control target
= control target key end

     0   :  { %s1952_s27 = smov 0   ;;  %s2211_s0 = inlined_call_operand.vmem [shape: f32[2,8,512], index: 0, kind: input, shape index: {}]   ;;  %s2212_s1 = inlined_call_operand.vmem [shape: bf16[512,32], index: 1, kind: input, shape index: {}]   ;;  %s2213_s2 = inlined_call_operand.vmem [shape: f32[1,32], index: 2, kind: input, shape index: {}]   ;;  %s2214_s3 = inlined_call_operand.vmem [shape: f32[8,32], index: 3, kind: input, shape index: {}]   ;;  %s2215_s4 = inlined_call_operand.vmem [shape: f32[1,32], index: 4, kind: input, shape index: {}]   ;;  %s2216_s5 = inlined_call_operand.vmem [shape: f32[1,32], index: 5, kind: input, shape index: {}]   ;;  %s2217_s6 = inlined_call_operand.vmem [shape: bf16[32,96], index: 6, kind: input, shape index: {}]   ;;  %s2218_s7 = inlined_call_operand.vmem [shape: f32[1,32], index: 7, kind: input, shape index: {}]   ;;  %s2219_s8 = inlined_call_operand.vmem [shape: f32[1,32], index: 8, kind: input, shape index: {}]   ;;  %s2220_s9 = inlined_call_operand.vmem [shape: bf16[32,128], index: 9, kind: input, shape index: {}]   ;;  %s2221_s10 = inlined_call_operand.vmem [shape: f32[1,128], index: 10, kind: input, shape index: {}]   ;;  %s2222_s11 = inlined_call_operand.vmem [shape: bf16[128,32], index: 11, kind: input, shape index: {}]   ;;  %s2223_s12 = inlined_call_operand.vmem [shape: f32[1,32], index: 12, kind: input, shape index: {}]   ;;  %s2224_s13 = inlined_call_operand.vmem [shape: bf16[32,16], index: 13, kind: input, shape index: {}]   ;;  %s2225_s14 = inlined_call_operand.vmem [shape: f32[1,16], index: 14, kind: input, shape index: {}]   ;;  %s2226_s15 = inlined_call_operand.vmem [shape: f32[1,16], index: 15, kind: input, shape index: {}]   ;;  %s2227_s16 = inlined_call_operand.vmem [shape: f32[16,128], index: 16, kind: input, shape index: {}]   ;;  %s2228_s17 = inlined_call_operand.vmem [shape: f32[8,128], index: 17, kind: input, shape index: {}]   ;;  %s2229_s18 = inlined_call_operand.vmem [shape: f32[2,1,128], index: 18, kind: output, shape index: {}]  }
   0x1   :  { %2232 = sst [smem:[#allocation3_spill]] %s2211_s0 }
   0x2   :  { %2233 = sst [smem:[#allocation4_spill]] %s2212_s1 }
   0x3   :  { %2234 = sst [smem:[#allocation5_spill]] %s2213_s2 }
   0x4 LB: > { %2235 = sst [smem:[#allocation2_spill]] %s1851_s27  ;;  %s1572_s28 = sadd.s32 4294967295, %s1851_s27   ;;  %s1851_s27 = sphi %s1952_s27, %s28_s27  }
   0x5   : > { %p1576_p0 = scmp.ge.s32.totalorder %s1851_s27, 1  ;;  %p512_p1 = scmp.lt.s32.totalorder %s1851_s27, 3 }
   0x7   : > { %p513_p2 = pnand %p1576_p0, %p512_p1 }
   0x8   : > { %s2236_s0 = sld [smem:[#allocation4_spill]] (!%p513_p2)  ;;  %p564_p3 = scmp.lt.s32.totalorder (!%p513_p2), %s1572_s28, 1 }
   0x9   : > { %516 = sbr.rel (%p513_p2) target bundleno = 3028 (0xbd4), region = 92  ;;  %s2237_s1 = sld [smem:[#allocation3_spill]] (!%p513_p2) }
   0xa   : > { %s2238_s24 = sld [smem:[#allocation5_spill]] (!%p513_p2)  ;;  %s1855_s27 = smov (!%p513_p2), 96  }
   0xe   : > { %v1787_v0 = vld [vmem:[%s2236_s0 + $0x78] sm:$0xff]   ;;  %v1791_v4 = vld [vmem:[%s2236_s0 + $0x70] sm:$0xff]   ;;  %v1795_v8 = vld [vmem:[%s2236_s0 + $0x68] sm:$0xff]   ;;  %s2241_s28 = smov (!%p564_p3, %s1572_s28), 1  ;;  %vm928_vm0 = vcmask 261120   ;;  %v1853_v62 = vmov 0.0  }
   0xf   : > { %v1788_v1 = vld [vmem:[%s2236_s0 + $0xf8] sm:$0xff]   ;;  %1643 = vmatprep.subr.bf16.mxu0 %v1787_v0  ;;  %v1792_v5 = vld [vmem:[%s2236_s0 + $0xf0] sm:$0xff]   ;;  %v1796_v9 = vld [vmem:[%s2236_s0 + $0xe8] sm:$0xff]   ;;  %s1642_s22 = sshll.u32 %s2241_s28, 5  ;;  %vm1854_vm1 = vmmov 0   ;;  %vm1068_vm2 = vcmask 64512   ;;  %s571_s19 = scalar_lea.vmem %s2229_s18, %s2241_s28 }
  0x10   : > { %v1789_v2 = vld [vmem:[%s2236_s0 + $0x38] sm:$0xff]   ;;  %1665 = vmatprep.subr.bf16.mxu1 %v1788_v1  ;;  %v1793_v6 = vld [vmem:[%s2236_s0 + $0x30] sm:$0xff]   ;;  %v1797_v10 = vld [vmem:[%s2236_s0 + $0x28] sm:$0xff]   ;;  %s568_s20 = scalar_lea.vmem %s2237_s1, %s1642_s22  ;;  %s1856_s22 = smov 64   ;;  %vm1086_vm3 = vcmask 1043456   ;;  %vm1412_vm4 = vcmask 130048  }
  0x11   : > { %v1790_v3 = vld [vmem:[%s2236_s0 + $0xb8] sm:$0xff]   ;;  %1644 = vmatpush3.bf16.msra.mxu0 %v1789_v2  ;;  %v1794_v7 = vld [vmem:[%s2236_s0 + $0xb0] sm:$0xff]   ;;  %v1798_v11 = vld [vmem:[%s2236_s0 + $0xa8] sm:$0xff]  }
  0x12   : > { %1666 = vmatpush3.bf16.msra.mxu1 %v1790_v3  ;;  %1645 = vmatprep.subr.bf16.mxu0 %v1791_v4  ;;  %v1799_v12 = vld [vmem:[%s2236_s0 + $0x60] sm:$0xff]   ;;  %v1803_v16 = vld [vmem:[%s2236_s0 + $0x58] sm:$0xff]   ;;  %v1807_v20 = vld [vmem:[%s2236_s0 + $0x50] sm:$0xff]  }
  0x13   : > { %1667 = vmatprep.subr.bf16.mxu1 %v1792_v5  ;;  %v1800_v13 = vld [vmem:[%s2236_s0 + $0xe0] sm:$0xff]   ;;  %v1804_v17 = vld [vmem:[%s2236_s0 + $0xd8] sm:$0xff]   ;;  %v1808_v21 = vld [vmem:[%s2236_s0 + $0xd0] sm:$0xff]  }
  0x14   : > { %v1801_v14 = vld [vmem:[%s2236_s0 + $0x20] sm:$0xff]   ;;  %v1805_v18 = vld [vmem:[%s2236_s0 + $0x18] sm:$0xff]   ;;  %v1809_v22 = vld [vmem:[%s2236_s0 + $0x10] sm:$0xff]  }
  0x15   : > { %1646 = vmatpush3.bf16.msra.mxu0 %v1793_v6  ;;  %v1802_v15 = vld [vmem:[%s2236_s0 + $0xa0] sm:$0xff]   ;;  %v1806_v19 = vld [vmem:[%s2236_s0 + $0x98] sm:$0xff]   ;;  %v1810_v23 = vld [vmem:[%s2236_s0 + $0x90] sm:$0xff]  }
  0x16   : > { %1668 = vmatpush3.bf16.msra.mxu1 %v1794_v7  ;;  %1647 = vmatprep.subr.bf16.mxu0 %v1795_v8  ;;  %v1811_v24 = vld [vmem:[%s2236_s0 + $0x48] sm:$0xff]   ;;  %v1815_v28 = vld [vmem:[%s2236_s0 + $0x40] sm:$0xff]   ;;  %v576_v33 = vld [vmem:[%s568_s20 + $0x18] sm:$0xff] }
  0x17   : > { %1669 = vmatprep.subr.bf16.mxu1 %v1796_v9  ;;  %v1812_v25 = vld [vmem:[%s2236_s0 + $0xc8] sm:$0xff]   ;;  %v1816_v29 = vld [vmem:[%s2236_s0 + $0xc0] sm:$0xff]   ;;  %v580_v36 = vpack.c.bf16 %v576_v33, %v576_v33  ;;  %v575_v38 = vld [vmem:[%s568_s20 + $0x10] sm:$0xff] }
  0x18   : > { %v1813_v26 = vld [vmem:[%s2236_s0 + $0x8] sm:$0xff]   ;;  %v1817_v30 = vld [vmem:[%s2236_s0] sm:$0xff]   ;;  %v579_v39 = vpack.c.bf16 %v575_v38, %v575_v38 }
  0x19   : > { %1648 = vmatpush3.bf16.msra.mxu0 %v1797_v10  ;;  %v1814_v27 = vld [vmem:[%s2236_s0 + $0x88] sm:$0xff]   ;;  %v1818_v31 = vld [vmem:[%s2236_s0 + $0x80] sm:$0xff]   ;;  %916 = vmatprep.mubr.bf16.mxu1 %v580_v36 }
  0x1a   : > { %1670 = vmatpush3.bf16.msra.mxu1 %v1798_v11  ;;  %1649 = vmatprep.subr.bf16.mxu0 %v1799_v12  ;;  %v574_v32 = vld [vmem:[%s568_s20 + $0x8] sm:$0xff]  ;;  %v573_v34 = vld [vmem:[%s568_s20] sm:$0xff] }
  0x1b   : > { %1671 = vmatprep.subr.bf16.mxu1 %v1800_v13  ;;  %v578_v35 = vpack.c.bf16 %v574_v32, %v574_v32  ;;  %v577_v37 = vpack.c.bf16 %v573_v34, %v573_v34  ;;  %v1579_v42 = vld [vmem:[%s2238_s24] ss:$0 sm:$0xff]  ;;  %v1819_v61 = vld [vmem:[%s2217_s6 + $0x8] sm:$0xff]  }
  0x1c   : > { %v924_v52 = vld [vmem:[%s2214_s3] sm:$0xff] }
  0x1d   : > { %1650 = vmatpush3.bf16.msra.mxu0 %v1801_v14  ;;  %876 = vmatprep.mubr.bf16.mxu0 %v578_v35  ;;  %v1820_v63 = vld [vmem:[%s2217_s6] sm:$0xff]  }
  0x1e   : > { %1672 = vmatpush3.bf16.msra.mxu1 %v1802_v15  ;;  %1651 = vmatprep.subr.bf16.mxu0 %v1803_v16  ;;  %v1612_v4 = vld [vmem:[%s2215_s4] ss:$0 sm:$0xff] }
  0x1f   : > { %1673 = vmatprep.subr.bf16.mxu1 %v1804_v17  ;;  %v1613_v6 = vld [vmem:[%s2216_s5] ss:$0 sm:$0xff] }
  0x21   : > { %1652 = vmatpush3.bf16.msra.mxu0 %v1805_v18 }
  0x22   : > { %1674 = vmatpush3.bf16.msra.mxu1 %v1806_v19  ;;  %1653 = vmatprep.subr.bf16.mxu0 %v1807_v20 }
  0x23   : > { %1675 = vmatprep.subr.bf16.mxu1 %v1808_v21 }
  0x25   : > { %1654 = vmatpush3.bf16.msra.mxu0 %v1809_v22 }
  0x26   : > { %1676 = vmatpush3.bf16.msra.mxu1 %v1810_v23  ;;  %1655 = vmatprep.subr.bf16.mxu0 %v1811_v24 }
  0x27   : > { %1677 = vmatprep.subr.bf16.mxu1 %v1812_v25 }
  0x29   : > { %1656 = vmatpush3.bf16.msra.mxu0 %v1813_v26 }
  0x2a   : > { %1678 = vmatpush3.bf16.msra.mxu1 %v1814_v27  ;;  %1657 = vmatprep.subr.bf16.mxu0 %v1815_v28 }
  0x2b   : > { %1679 = vmatprep.subr.bf16.mxu1 %v1816_v29 }
  0x2d   : > { %1658 = vmatpush3.bf16.msra.mxu0 %v1817_v30 }
  0x2e   : > { %1680 = vmatpush3.bf16.msra.mxu1 %v1818_v31  ;;  %1726 = vmatprep.subr.bf16.mxu0 %v1853_v62 }
  0x2f   : > { %1712 = vmatprep.subr.bf16.mxu1 %v1853_v62 }
  0x30   : > { %877 = vmatmul.mubr.bf16.vlgmr.msra.gmra.mxu0 %v577_v37 }
  0x31   : > { %917 = vmatmul.mubr.bf16.vlgmr.msra.gmra.mxu1 %v579_v39  ;;  %1728 = vmatprep.mubr.msk.bf16.mxu0 %vm1854_vm1, %v1853_v62 }
  0x32   : > { %1713 = vmatpush3.bf16.msra.mxu1 %v1819_v61  ;;  %1716 = vmatprep.mubr.msk.bf16.mxu1 %vm1854_vm1, %v1853_v62  ;;  %v1827_v61 = vld [vmem:[%s2222_s11 + $0x18] sm:$0xff]  }
  0x33   : > { %1714 = vmatprep.subr.bf16.mxu1 %v1853_v62 }
  0x36   : > { %1715 = vmatpush3.bf16.msra.mxu1 %v1820_v63  ;;  %v1828_v63 = vld [vmem:[%s2222_s11 + $0x10] sm:$0xff]  }
  0x37   : > { %1720 = vmatprep.subr.bf16.mxu1 %v1853_v62 }
  0xf0   : > { %v1659_v40 = vpop.f32.mrf.mxu0 }
  0xf1   : > { %v1681_v41 = vpop.f32.mrf.mxu1 }
  0xf2   : > { %v1660_v43 = vpop.f32.mrf.mxu0 }
  0xf3   : > { %v1682_v44 = vpop.f32.mrf.mxu1  ;;  %v1661_v45 = vadd.f32 %v1660_v43, %v1659_v40 }
  0xf4   : > { %v1662_v46 = vpop.f32.mrf.mxu0  ;;  %v1683_v49 = vadd.f32 %v1682_v44, %v1681_v41 }
  0xf5   : > { %v1684_v47 = vpop.f32.mrf.mxu1  ;;  %v879_v48 = vadd.f32 %v1661_v45, %v1579_v42  ;;  %v1821_v45 = vld [vmem:[%s2220_s9 + $0x8] sm:$0xff]   ;;  %v1822_v46 = vld [vmem:[%s2220_s9] sm:$0xff]  }
  0xf6   : > { %v1663_v50 = vpop.f32.mrf.mxu0 }
  0xf7   : > { %v1685_v51 = vpop.f32.mrf.mxu1  ;;  %v919_v53 = vadd.f32 %v1683_v49, %v879_v48 }
  0xf8   : > { %v1619_v51 = vld [vmem:[%s2218_s7] ss:$0 sm:$0xff] }
  0xf9   : > { %v2072_v54 = vadd.f32 %v924_v52, %v919_v53  ;;  %v1620_v53 = vld [vmem:[%s2219_s8] ss:$0 sm:$0xff] }
  0xfb   : > { %v929_v55 = vsel %vm928_vm0, %v2072_v54, 0.0 }
  0xfc   : > { %930 = vadd.xlane.f32.xlu0 %v929_v55 }
 0x185   : > { %v931_v56 = vpop.xlane.xlu0 %930 }
 0x186   : > { %v933_v57 = vmul.f32 0.03125, %v931_v56 }
 0x188   : > { %v934_v58 = vsub.f32 %v2072_v54, %v933_v57  ;;  %v1823_v57 = vld [vmem:[%s2222_s11 + $0x38] sm:$0xff]  }
 0x18a   : > { %v935_v59 = vmul.f32 %v934_v58, %v934_v58 }
 0x18c   : > { %v936_v60 = vsel %vm928_vm0, %v935_v59, 0.0  ;;  %v1825_v59 = vld [vmem:[%s2222_s11 + $0x28] sm:$0xff]  }
 0x18d   : > { %937 = vadd.xlane.f32.xlu0 %v936_v60  ;;  %v1826_v60 = vld [vmem:[%s2222_s11 + $0x20] sm:$0xff]  }
 0x216   : > { %v938_v0 = vpop.xlane.xlu0 %937 }
 0x217   : > { %v939_v1 = vmul.f32 0.03125, %v938_v0  ;;  %v1829_v0 = vld [vmem:[%s2222_s11 + $0x8] sm:$0xff]  }
 0x219   : > { %v940_v2 = vadd.f32 1e-06, %v939_v1  ;;  %v1830_v1 = vld [vmem:[%s2222_s11] sm:$0xff]  }
 0x21b   : > { %1833 = vrsqrt.f32 %v940_v2  ;;  %v1621_v2 = vld [vmem:[%s2221_s10] ss:$0 sm:$0xff] }
 0x228   : > { %v1834_v3 = vpop.eup %1833 }
 0x229   : > { %v942_v5 = vmul.f32 %v1834_v3, %v934_v58  ;;  %v1824_v58 = vld [vmem:[%s2222_s11 + $0x30] sm:$0xff]  }
 0x22b   : > { %v949_v7 = vmul.f32 %v1612_v4, %v942_v5 }
 0x22d   : > { %v956_v8 = vadd.f32 %v1613_v6, %v949_v7 }
 0x22f   : > { %v957_v9 = vpack.c.bf16 %v956_v8, %v956_v8 }
 0x231   : > { %1717 = vmatmul.mubr.msk.bf16.vlgmr.msra.gmra.mxu1 %vm928_vm0, %v957_v9 }
 0x232   : > { %1722 = vmatprep.mubr.msk.bf16.mxu1 %vm1854_vm1, %v1853_v62 }
 0x2f1   : > { %v1011_v10 = vpop.f32.mrf.mxu1 }
 0x2f2   : > { %v1017_v11 = vpack.c.bf16 %v1011_v10, %v1011_v10 }
 0x2f3   : > { %v1718_v12 = vpop.f32.mrf.mxu1 }
 0x2f4   : > { %1019 = vrot.lane.b32.xlu1 %v1017_v11, %s1855_s27 }
 0x2f5   : > { %v1014_v13 = vpop.f32.mrf.mxu1 }
 0x2f7   : > { %v1719_v14 = vpop.f32.mrf.mxu1 }
 0x366   : > { %v1020_v15 = vpop.permute.xlu1 %1019 }
 0x367   : > { %v1025_v16 = vsel %vm928_vm0, %v1020_v15, 0 }
 0x368   : > { %1721 = vmatpush3.bf16.xpose.msra.mxu1 %v1025_v16 }
 0x369   : > { %1732 = vmatprep.subr.bf16.mxu1 %v1853_v62 }
 0x36f   : > { %1723 = vmatmul.mubr.msk.bf16.vlgmr.msra.gmra.mxu1 %vm928_vm0, %v1017_v11 }
 0x370   : > { %1736 = vmatprep.mubr.msk.bf16.mxu1 %vm1854_vm1, %v1853_v62  ;;  %1733 = vmatpush3.bf16.msra.mxu1 %v1821_v45 }
 0x371   : > { %1734 = vmatprep.subr.bf16.mxu1 %v1853_v62 }
 0x374   : > { %1735 = vmatpush3.bf16.msra.mxu1 %v1822_v46  ;;  %v1638_v46 = vld [vmem:[%s2226_s15] ss:$0 sm:$0xff] }
 0x375   : > { %1760 = vmatprep.subr.bf16.mxu1 %v1853_v62 }
 0x42f   : > { %v1061_v17 = vpop.f32.mrf.mxu1 }
 0x430   : > { %v1067_v18 = vmul.f32 0.17677669, %v1061_v17 }
 0x431   : > { %v1724_v19 = vpop.f32.mrf.mxu1 }
 0x432   : > { %v1069_v20 = vsel %vm1068_vm2, %v1067_v18, -inf  ;;  %v1832_v19 = vld [vmem:[%s2224_s13] sm:$0xff]  }
 0x433   : > { %1070 = vmax.xlane.f32.xlu1 %v1069_v20  ;;  %v1064_v21 = vpop.f32.mrf.mxu1 }
 0x434   : > { %v1633_v21 = vld [vmem:[%s2223_s12] ss:$0 sm:$0xff] }
 0x435   : > { %v1725_v22 = vpop.f32.mrf.mxu1 }
 0x4bc   : > { %v1071_v23 = vpop.xlane.xlu1 %1070 }
 0x4bd   : > { %v1072_v24 = vsub.f32 %v1067_v18, %v1071_v23  ;;  %v1831_v18 = vld [vmem:[%s2224_s13 + $0x8] sm:$0xff]  }
 0x4bf   : > { %v1073_v25 = vmul.f32 1.442695, %v1072_v24 }
 0x4c1   : > { %1835 = vpow2.f32 %v1073_v25 }
 0x4ce   : > { %v1836_v26 = vpop.eup %1835 }
 0x4cf   : > { %v1075_v27 = vsel %vm1068_vm2, %v1836_v26, 0.0 }
 0x4d0   : > { %1076 = vadd.xlane.f32.xlu0 %v1075_v27 }
 0x4e6   : > { %1081 = vrot.lane.b32.xlu0 %v1017_v11, %s1856_s22 }
 0x559   : > { %v1077_v28 = vpop.xlane.xlu0 %1076 }
 0x55a   : > { %1837 = vrcp.f32 %v1077_v28 }
 0x55d   : > { %v1082_v29 = vpop.permute.xlu0 %1081 }
 0x55e   : > { %v1088_v30 = vsel %vm1086_vm3, %v1082_v29, 0 }
 0x55f   : > { %1727 = vmatpush3.bf16.msra.mxu0 %v1088_v30 }
 0x560   : > { %1740 = vmatprep.subr.bf16.mxu0 %v1853_v62 }
 0x567   : > { %v1838_v31 = vpop.eup %1837 }
 0x568   : > { %v1079_v32 = vmul.f32 %v1838_v31, %v1836_v26 }
 0x56a   : > { %v1080_v33 = vpack.c.bf16 %v1079_v32, %v1079_v32 }
 0x56c   : > { %1729 = vmatmul.mubr.msk.bf16.vlgmr.msra.gmra.mxu0 %vm1068_vm2, %v1080_v33 }
 0x56d   : > { %1756 = vmatprep.mubr.msk.bf16.mxu0 %vm1854_vm1, %v1853_v62  ;;  %1741 = vmatpush3.bf16.msra.mxu0 %v1823_v57 }
 0x56e   : > { %1742 = vmatprep.subr.bf16.mxu0 %v1853_v62 }
 0x571   : > { %1743 = vmatpush3.bf16.msra.mxu0 %v1824_v58 }
 0x572   : > { %1744 = vmatprep.subr.bf16.mxu0 %v1853_v62 }
 0x575   : > { %1745 = vmatpush3.bf16.msra.mxu0 %v1825_v59 }
 0x576   : > { %1746 = vmatprep.subr.bf16.mxu0 %v1853_v62 }
 0x579   : > { %1747 = vmatpush3.bf16.msra.mxu0 %v1826_v60 }
 0x57a   : > { %1748 = vmatprep.subr.bf16.mxu0 %v1853_v62 }
 0x57d   : > { %1749 = vmatpush3.bf16.msra.mxu0 %v1827_v61 }
 0x57e   : > { %1750 = vmatprep.subr.bf16.mxu0 %v1853_v62 }
 0x581   : > { %1751 = vmatpush3.bf16.msra.mxu0 %v1828_v63 }
 0x582   : > { %1752 = vmatprep.subr.bf16.mxu0 %v1853_v62 }
 0x585   : > { %1753 = vmatpush3.bf16.msra.mxu0 %v1829_v0 }
 0x586   : > { %1754 = vmatprep.subr.bf16.mxu0 %v1853_v62 }
 0x589   : > { %1755 = vmatpush3.bf16.msra.mxu0 %v1830_v1 }
 0x62c   : > { %v1124_v34 = vpop.f32.mrf.mxu0 }
 0x62d   : > { %v2113_v35 = vadd.f32 %v1124_v34, %v2072_v54 }
 0x62e   : > { %v1730_v36 = vpop.f32.mrf.mxu0 }
 0x62f   : > { %v1133_v37 = vsel %vm928_vm0, %v2113_v35, 0.0 }
 0x630   : > { %1134 = vadd.xlane.f32.xlu0 %v1133_v37  ;;  %v1127_v38 = vpop.f32.mrf.mxu0 }
 0x631   : > { %v1442_v38 = vld [vmem:[%s2227_s16 + $0x8] sm:$0xff] }
 0x632   : > { %v1731_v39 = vpop.f32.mrf.mxu0 }
 0x633   : > { %v1441_v39 = vld [vmem:[%s2227_s16] sm:$0xff] }
 0x6b9   : > { %v1135_v40 = vpop.xlane.xlu0 %1134 }
 0x6ba   : > { %v1136_v41 = vmul.f32 0.03125, %v1135_v40 }
 0x6bc   : > { %v1137_v42 = vsub.f32 %v2113_v35, %v1136_v41 }
 0x6be   : > { %v1138_v43 = vmul.f32 %v1137_v42, %v1137_v42 }
 0x6c0   : > { %v1139_v44 = vsel %vm928_vm0, %v1138_v43, 0.0 }
 0x6c1   : > { %1140 = vadd.xlane.f32.xlu1 %v1139_v44  ;;  %v1637_v44 = vld [vmem:[%s2225_s14] ss:$0 sm:$0xff] }
 0x74a   : > { %v1141_v47 = vpop.xlane.xlu1 %1140 }
 0x74b   : > { %v1142_v48 = vmul.f32 0.03125, %v1141_v47 }
 0x74d   : > { %v1143_v49 = vadd.f32 1e-06, %v1142_v48 }
 0x74f   : > { %1839 = vrsqrt.f32 %v1143_v49 }
 0x75c   : > { %v1840_v50 = vpop.eup %1839 }
 0x75d   : > { %v1145_v52 = vmul.f32 %v1840_v50, %v1137_v42 }
 0x75f   : > { %v1152_v54 = vmul.f32 %v1619_v51, %v1145_v52 }
 0x761   : > { %v1159_v55 = vadd.f32 %v1620_v53, %v1152_v54 }
 0x763   : > { %v1160_v56 = vpack.c.bf16 %v1159_v55, %v1159_v55 }
 0x765   : > { %1737 = vmatmul.mubr.msk.bf16.vlgmr.msra.gmra.mxu1 %vm928_vm0, %v1160_v56 }
 0x766   : > { %1764 = vmatprep.mubr.msk.bf16.mxu1 %vm1854_vm1, %v1853_v62  ;;  %1761 = vmatpush3.bf16.msra.mxu1 %v1831_v18 }
 0x767   : > { %1762 = vmatprep.subr.bf16.mxu1 %v1853_v62 }
 0x76a   : > { %1763 = vmatpush3.bf16.msra.mxu1 %v1832_v19 }
 0x76b   : > { %1768 = vmatprep.subr.mxu1 %v1853_v62 }
 0x825   : > { %v1221_v3 = vpop.f32.mrf.mxu1 }
 0x826   : > { %v1222_v4 = vadd.f32 %v1621_v2, %v1221_v3 }
 0x827   : > { %v1738_v5 = vpop.f32.mrf.mxu1 }
 0x828   : > { %v1227_v6 = vmul.f32 %v1222_v4, %v1222_v4 }
 0x829   : > { %v1224_v7 = vpop.f32.mrf.mxu1 }
 0x82a   : > { %v1228_v8 = vmul.f32 %v1227_v6, %v1222_v4 }
 0x82b   : > { %v1739_v9 = vpop.f32.mrf.mxu1 }
 0x82c   : > { %v1229_v10 = vmul.f32 0.044715, %v1228_v8 }
 0x82e   : > { %v1230_v11 = vadd.f32 %v1229_v10, %v1222_v4 }
 0x830   : > { %v1231_v12 = vmul.f32 0.7978846, %v1230_v11 }
 0x832   : > { %1841 = vtanh.f32 %v1231_v12 }
 0x83f   : > { %v1842_v13 = vpop.eup %1841 }
 0x840   : > { %v1233_v14 = vadd.f32 1.0, %v1842_v13 }
 0x842   : > { %v1234_v15 = vmul.f32 0.5, %v1233_v14 }
 0x844   : > { %v1235_v16 = vmul.f32 %v1234_v15, %v1222_v4 }
 0x846   : > { %v1236_v17 = vpack.c.bf16 %v1235_v16, %v1235_v16 }
 0x848   : > { %1757 = vmatmul.mubr.bf16.vlgmr.msra.gmra.mxu0 %v1236_v17 }
 0x908   : > { %v1335_v20 = vpop.f32.mrf.mxu0 }
 0x909   : > { %v1341_v22 = vadd.f32 %v1335_v20, %v2113_v35 }
 0x90a   : > { %v1758_v23 = vpop.f32.mrf.mxu0 }
 0x90b   : > { %v1349_v24 = vadd.f32 %v1633_v21, %v1341_v22 }
 0x90c   : > { %v1338_v25 = vpop.f32.mrf.mxu0 }
 0x90d   : > { %v1350_v26 = vpack.c.bf16 %v1349_v24, %v1349_v24 }
 0x90e   : > { %v1759_v27 = vpop.f32.mrf.mxu0 }
 0x90f   : > { %1765 = vmatmul.mubr.msk.bf16.vlgmr.msra.gmra.mxu1 %vm928_vm0, %v1350_v26 }
 0x910   : > { %1772 = vmatprep.mubr.msk.f32.mxu1 %vm1854_vm1, %v1853_v62  ;;  %1769 = vmatpush3.msra.mxu1 %v1442_v38 }
 0x911   : > { %1770 = vmatprep.subr.mxu1 %v1853_v62  ;;  %v1516_v62 = vld [vmem:[%s2228_s17] sm:$0xff] }
 0x912   : > { %1771 = vmatpush3.msra.mxu1 %v1441_v39 }
 0x9cf   : > { %v1404_v28 = vpop.f32.mrf.mxu1 }
 0x9d0   : > { %v1413_v29 = vsel %vm1412_vm4, %v1404_v28, 0.0 }
 0x9d1   : > { %1414 = vadd.xlane.f32.xlu1 %v1413_v29  ;;  %v1766_v30 = vpop.f32.mrf.mxu1 }
 0x9d3   : > { %v1407_v31 = vpop.f32.mrf.mxu1 }
 0x9d5   : > { %v1767_v32 = vpop.f32.mrf.mxu1 }
 0xa5a   : > { %v1415_v33 = vpop.xlane.xlu1 %1414 }
 0xa5b   : > { %v1417_v34 = vmul.f32 0.0625, %v1415_v33 }
 0xa5d   : > { %v1418_v35 = vsub.f32 %v1404_v28, %v1417_v34 }
 0xa5f   : > { %v1419_v36 = vmul.f32 %v1418_v35, %v1418_v35 }
 0xa61   : > { %v1420_v37 = vsel %vm1412_vm4, %v1419_v36, 0.0 }
 0xa62   : > { %1421 = vadd.xlane.f32.xlu1 %v1420_v37 }
 0xaeb   : > { %v1422_v40 = vpop.xlane.xlu1 %1421 }
 0xaec   : > { %v1423_v41 = vmul.f32 0.0625, %v1422_v40 }
 0xaee   : > { %v1424_v42 = vadd.f32 1e-06, %v1423_v41 }
 0xaf0   : > { %1843 = vrsqrt.f32 %v1424_v42 }
 0xafd   : > { %v1844_v43 = vpop.eup %1843 }
 0xafe   : > { %v1426_v45 = vmul.f32 %v1844_v43, %v1418_v35 }
 0xb00   : > { %v1433_v47 = vmul.f32 %v1637_v44, %v1426_v45 }
 0xb02   : > { %v1440_v48 = vadd.f32 %v1638_v46, %v1433_v47 }
 0xb04   : > { %1773 = vmatmul.mubr.msk.f32.vlgmr.msra.gmra.mxu1 %vm1412_vm4, %v1440_v48 }
 0xbc4   : > { %v1512_v49 = vpop.f32.mrf.mxu1 }
 0xbc5   : > { %v1517_v50 = vmul.f32 %v1516_v62, %v1512_v49 }
 0xbc6   : > { %v1774_v51 = vpop.f32.mrf.mxu1 }
 0xbc7   : > { %v1518_v52 = vrot.slane %v1517_v50, 4 }
 0xbc9   : > { %v1519_v53 = vadd.f32 %v1518_v52, %v1517_v50 }
 0xbcb   : > { %v1520_v54 = vrot.slane %v1519_v53, 2 }
 0xbcd   : > { %v1521_v55 = vadd.f32 %v1520_v54, %v1519_v53 }
 0xbcf   : > { %v1522_v56 = vrot.slane %v1521_v55, 1 }
 0xbd1   : > { %v1523_v57 = vadd.f32 %v1522_v56, %v1521_v55 }
 0xbd3   : > { %1524 = vst [vmem:[%s571_s19] sm:$0x1] %v1523_v57 }
 0xbd4 PF: > { %s2239_s1 = sld [smem:[#allocation2_spill]] }
 0xbda   : > { %s28_s27 = sadd.s32 1, %s2239_s1  }
 0xbdb   : > { %p25_p4 = scmp.ge.s32.totalorder %s28_s27, 4  }
 0xbdd   :  { %27 = sbr.rel (!%p25_p4) target bundleno = 4 (0x4), region = 122 }

// kernel: sam3d_core.3
= control target key start
LH: loop header
LB: loop body
LE: loop exit
PB: predicated region body
PF: predicated region fallthrough
CT: control target
= control target key end

     0   :  { %s2318_s0 = inlined_call_operand.vmem [shape: f32[2,7,16], index: 0, kind: input, shape index: {}]   ;;  %s2319_s1 = inlined_call_operand.vmem [shape: f32[2,8,16], index: 1, kind: input, shape index: {}]   ;;  %s2320_s2 = inlined_call_operand.vmem [shape: f32[8,16], index: 2, kind: input, shape index: {}]   ;;  %s2321_s3 = inlined_call_operand.vmem [shape: f32[2,16,512], index: 3, kind: input, shape index: {}]   ;;  %s2322_s4 = inlined_call_operand.vmem [shape: bf16[16,16], index: 4, kind: input, shape index: {}]   ;;  %s2323_s5 = inlined_call_operand.vmem [shape: bf16[16,16], index: 5, kind: input, shape index: {}]   ;;  %s2324_s6 = inlined_call_operand.vmem [shape: bf16[16,16], index: 6, kind: input, shape index: {}]   ;;  %s2325_s7 = inlined_call_operand.vmem [shape: f32[1,16], index: 7, kind: input, shape index: {}]   ;;  %s2326_s8 = inlined_call_operand.vmem [shape: f32[1,16], index: 8, kind: input, shape index: {}]   ;;  %s2327_s9 = inlined_call_operand.vmem [shape: bf16[16,32], index: 9, kind: input, shape index: {}]   ;;  %s2328_s10 = inlined_call_operand.vmem [shape: f32[1,32], index: 10, kind: input, shape index: {}]   ;;  %s2329_s11 = inlined_call_operand.vmem [shape: bf16[32,16], index: 11, kind: input, shape index: {}]   ;;  %s2330_s12 = inlined_call_operand.vmem [shape: f32[1,16], index: 12, kind: input, shape index: {}]   ;;  %s2331_s13 = inlined_call_operand.vmem [shape: bf16[2,16], index: 13, kind: input, shape index: {}]   ;;  %s2332_s14 = inlined_call_operand.vmem [shape: f32[2,1], index: 14, kind: input, shape index: {}]   ;;  %s2333_s15 = inlined_call_operand.vmem [shape: bf16[16,64], index: 15, kind: input, shape index: {}]   ;;  %s2334_s16 = inlined_call_operand.vmem [shape: f32[4,64], index: 16, kind: input, shape index: {}]   ;;  %s2335_s17 = inlined_call_operand.vmem [shape: bf16[64,2], index: 17, kind: input, shape index: {}]   ;;  %s2336_s18 = inlined_call_operand.vmem [shape: bf16[16,16], index: 18, kind: input, shape index: {}]   ;;  %s2337_s19 = inlined_call_operand.vmem [shape: f32[1,16], index: 19, kind: input, shape index: {}]   ;;  %s2338_s20 = inlined_call_operand.vmem [shape: bf16[16,512], index: 20, kind: input, shape index: {}]   ;;  %s2339_s21 = inlined_call_operand.vmem [shape: f32[1,512], index: 21, kind: input, shape index: {}]   ;;  %s2340_s22 = inlined_call_operand.vmem [shape: f32[2,5,512], index: 22, kind: output, shape index: {}]  }
   0x1   :  { %2341 = sst [smem:[#allocation2_spill]] %s2318_s0 }
   0x2   :  { %2342 = sst [smem:[#allocation3_spill]] %s2319_s1 }
   0x3   :  { %2343 = sst [smem:[#allocation4_spill]] %s2320_s2 }
   0x4   :  { %2344 = sst [smem:[#allocation5_spill]] %s2321_s3  ;;  %s2107_s3 = smov 0  }
   0x5   :  { %2345 = sst [smem:[#allocation6_spill]] %s2322_s4 }
   0x6   :  { %2346 = sst [smem:[#allocation7_spill]] %s2323_s5 }
   0x7   :  { %2347 = sst [smem:[#allocation8_spill]] %s2324_s6 }
   0x8 LB: > { %s1788_s28 = sadd.s32 4294967295, %s1985_s3   ;;  %p1792_p0 = scmp.ge.s32.totalorder %s1985_s3, 1  ;;  %s1985_s3 = sphi %s2107_s3, %s32_s3  }
   0x9   : > { %p630_p1 = scmp.lt.s32.totalorder %s1985_s3, 3 }
   0xb   : > { %p631_p2 = pnand %p1792_p0, %p630_p1 }
   0xc   : > { %s2348_s4 = sld [smem:[#allocation7_spill]] (!%p631_p2)  ;;  %p700_p3 = scmp.lt.s32.totalorder (!%p631_p2), %s1788_s28, 1 }
   0xd   : > { %634 = sbr.rel (%p631_p2) target bundleno = 2175 (0x87f), region = 108  ;;  %s2349_s1 = sld [smem:[#allocation6_spill]] (!%p631_p2) }
   0xe   : > { %s2350_s25 = sld [smem:[#allocation4_spill]] (!%p631_p2) }
   0xf   : > { %s2351_s27 = sld [smem:[#allocation3_spill]] (!%p631_p2) }
  0x10   : > { %s2352_s0 = sld [smem:[#allocation2_spill]] (!%p631_p2) }
  0x11   : > { %s2353_s24 = sld [smem:[#allocation8_spill]] (!%p631_p2) }
  0x12   : > { %v1947_v0 = vld [vmem:[%s2348_s4] sm:$0xff]   ;;  %v1987_v1 = vmov 0.0   ;;  %vm1988_vm0 = vmmov 0   ;;  %s2356_s28 = smov (!%p700_p3, %s1788_s28), 1  ;;  %vm732_vm1 = vcmask 130048   ;;  %vm929_vm2 = vcmask 63488  }
  0x13   : > { %1868 = vmatprep.subr.bf16.mxu1 %v1987_v1  ;;  %1862 = vmatprep.subr.bf16.mxu0 %v1987_v1  ;;  %v1948_v2 = vld [vmem:[%s2349_s1] sm:$0xff]   ;;  %s1793_s5 = sshll.u32 %s2356_s28, 3  ;;  %vm947_vm3 = vcmask 1043456   ;;  %vm943_vm4 = vcmask 64512   ;;  %vm994_vm5 = vcmask 129024   ;;  %s2354_s6 = sld [smem:[#allocation5_spill]] }
  0x14   : > { %1869 = vmatpush3.bf16.msra.mxu1 %v1947_v0  ;;  %1870 = vmatprep.mubr.msk.bf16.mxu1 %vm1988_vm0, %v1987_v1  ;;  %v721_v3 = vld [vmem:[%s2350_s25] sm:$0xff]  ;;  %vm1100_vm6 = vcmask 261120   ;;  %vm1388_vm7 = vcmask 523264   ;;  %s1837_s1 = sshll.u32 %s2356_s28, 5 }
  0x15   : > { %1863 = vmatpush3.bf16.msra.mxu0 %v1948_v2  ;;  %1864 = vmatprep.mubr.msk.bf16.mxu0 %vm1988_vm0, %v1987_v1  ;;  %s707_s29 = scalar_lea.vmem %s2351_s27, %s1793_s5  ;;  %v1950_v54 = vld [vmem:[%s2327_s9] sm:$0xff]   ;;  %v1951_v2 = vld [vmem:[%s2329_s11 + $0x8] sm:$0xff]  }
  0x16   : > { %1880 = vmatprep.subr.bf16.mxu1 %v1987_v1  ;;  %1874 = vmatprep.subr.bf16.mxu0 %v1987_v1  ;;  %v720_v4 = vld [vmem:[%s707_s29] sm:$0xff]  ;;  %s703_s23 = scalar_lea.vmem %s2352_s0, %s1793_s5  ;;  %s1836_s0 = sshll.u32 %s2356_s28, 6 }
  0x17   : > { %v722_v5 = vadd.f32 %v721_v3, %v720_v4  ;;  %v2141_v6 = vld [vmem:[%s703_s23] sm:$0x7f]  ;;  %v828_v21 = vpack.c.bf16 %v720_v4, %v720_v4 }
  0x18   : > { %v723_v7 = vpack.c.bf16 %v2141_v6, %v2141_v6  ;;  %v1949_v20 = vld [vmem:[%s2353_s24] sm:$0xff]  }
  0x19   : > { %v776_v8 = vpack.c.bf16 %v722_v5, %v722_v5  ;;  %v1807_v59 = vld [vmem:[%s2325_s7] ss:$0 sm:$0xff]  ;;  %s2192_s25 = scalar_lea.vmem %s2354_s6, %s1836_s0  ;;  %s2296_s6 = scalar_lea.vmem %s2340_s22, %s1837_s1 }
  0x1a   : > { %1865 = vmatmul.mubr.msk.bf16.vlgmr.msra.gmra.mxu0 %vm732_vm1, %v723_v7  ;;  %v1808_v61 = vld [vmem:[%s2326_s8] ss:$0 sm:$0xff]  ;;  %v1155_v4 = vld [vmem:[%s2192_s25 + $0x8] sm:$0xff] }
  0x1b   : > { %1871 = vmatmul.mubr.msk.bf16.vlgmr.msra.gmra.mxu1 %vm732_vm1, %v776_v8  ;;  %1876 = vmatprep.mubr.msk.bf16.mxu0 %vm1988_vm0, %v1987_v1  ;;  %v1952_v3 = vld [vmem:[%s2329_s11] sm:$0xff]   ;;  %v1159_v5 = vld [vmem:[%s2192_s25 + $0x28] sm:$0xff] }
  0x1c   : > { %1882 = vmatprep.mubr.msk.bf16.mxu1 %vm1988_vm0, %v1987_v1  ;;  %1875 = vmatpush3.bf16.msra.mxu0 %v1949_v20  ;;  %v1163_v7 = vpack.c.bf16 %v1159_v5, %v1155_v4  ;;  %v1158_v8 = vld [vmem:[%s2192_s25 + $0x20] sm:$0xff] }
  0x1d   : > { %1886 = vmatprep.subr.bf16.mxu0 %v1987_v1  ;;  %v1953_v20 = vld [vmem:[%s2333_s15] sm:$0xff]  }
  0x22   : > { %1877 = vmatmul.mubr.msk.bf16.vlgmr.msra.gmra.mxu0 %vm732_vm1, %v828_v21  ;;  %v1166_v21 = vld [vmem:[%s2332_s14] sm:$0x3] }
  0x23   : > { %1888 = vmatprep.mubr.msk.bf16.mxu0 %vm1988_vm0, %v1987_v1 }
  0xda   : > { %v770_v9 = vpop.f32.mrf.mxu0 }
  0xdb   : > { %v822_v10 = vpop.f32.mrf.mxu1  ;;  %v880_v19 = vpack.c.bf16 %v770_v9, %v770_v9  ;;  %v1989_v9 = vmov 0  }
  0xdc   : > { %v881_v11 = vpack.c.bf16 %v822_v10, %v822_v10  ;;  %v1866_v12 = vpop.f32.mrf.mxu0  ;;  %1943 = vset.pattern.permute.xlu0 %v1989_v9  ;;  %1944 = vset.pattern.permute.xlu1 %v1989_v9 }
  0xdd   : > { %v1872_v13 = vpop.f32.mrf.mxu1  ;;  %v1809_v12 = vld [vmem:[%s2328_s10] ss:$0 sm:$0xff] }
  0xde   : > { %v886_v14 = vsel %vm732_vm1, %v881_v11, 0  ;;  %v773_v15 = vpop.f32.mrf.mxu0  ;;  %v1153_v11 = vld [vmem:[%s2331_s13] sm:$0x1] }
  0xdf   : > { %v825_v16 = vpop.f32.mrf.mxu1  ;;  %1881 = vmatpush3.bf16.xpose.msra.mxu1 %v886_v14 }
  0xe0   : > { %v1867_v17 = vpop.f32.mrf.mxu0  ;;  %1892 = vmatprep.subr.bf16.mxu1 %v1987_v1 }
  0xe1   : > { %v1873_v18 = vpop.f32.mrf.mxu1 }
  0xe2   : > { %v874_v33 = vpop.f32.mrf.mxu0 }
  0xe3   : > { %v942_v34 = vpack.c.bf16 %v874_v33, %v874_v33  ;;  %v1956_v33 = vld [vmem:[%s2335_s17 + $0x10] sm:$0xff]  }
  0xe4   : > { %v1878_v35 = vpop.f32.mrf.mxu0 }
  0xe5   : > { %v949_v36 = vsel %vm947_vm3, %v942_v34, 0  ;;  %v1815_v35 = vld [vmem:[%s2330_s12] ss:$0 sm:$0xff] }
  0xe6   : > { %1883 = vmatmul.mubr.msk.bf16.vlgmr.msra.gmra.mxu1 %vm732_vm1, %v880_v19  ;;  %v877_v37 = vpop.f32.mrf.mxu0  ;;  %1887 = vmatpush3.bf16.msra.mxu0 %v949_v36 }
  0xe7   : > { %1894 = vmatprep.mubr.msk.bf16.mxu1 %vm1988_vm0, %v1987_v1  ;;  %1898 = vmatprep.subr.bf16.mxu0 %v1987_v1 }
  0xe8   : > { %v1879_v38 = vpop.f32.mrf.mxu0  ;;  %1893 = vmatpush3.bf16.msra.mxu1 %v1950_v54 }
  0xe9   : > { %1189 = vmatprep.subr.bf16.mxu1 %v1163_v7 }
 0x1a6   : > { %v922_v22 = vpop.f32.mrf.mxu1 }
 0x1a7   : > { %v928_v23 = vmul.f32 0.25, %v922_v22  ;;  %v1157_v22 = vld [vmem:[%s2192_s25 + $0x18] sm:$0xff] }
 0x1a8   : > { %v1884_v24 = vpop.f32.mrf.mxu1 }
 0x1a9   : > { %v930_v25 = vsel %vm929_vm2, %v928_v23, -inf }
 0x1aa   : > { %931 = vmax.xlane.f32.xlu0 %v930_v25  ;;  %v925_v26 = vpop.f32.mrf.mxu1  ;;  %v1156_v25 = vld [vmem:[%s2192_s25 + $0x10] sm:$0xff] }
 0x1ab   : > { %v1160_v26 = vld [vmem:[%s2192_s25 + $0x30] sm:$0xff] }
 0x1ac   : > { %v1885_v27 = vpop.f32.mrf.mxu1 }
 0x1ad   : > { %v1164_v27 = vpack.c.bf16 %v1160_v26, %v1156_v25 }
 0x233   : > { %v932_v28 = vpop.xlane.xlu0 %931 }
 0x234   : > { %v933_v29 = vsub.f32 %v928_v23, %v932_v28  ;;  %v1161_v23 = vld [vmem:[%s2192_s25 + $0x38] sm:$0xff] }
 0x235   : > { %v1165_v24 = vpack.c.bf16 %v1161_v23, %v1157_v22 }
 0x236   : > { %v934_v30 = vmul.f32 1.442695, %v933_v29 }
 0x238   : > { %1965 = vpow2.f32 %v934_v30 }
 0x245   : > { %v1966_v31 = vpop.eup %1965 }
 0x246   : > { %v936_v32 = vsel %vm929_vm2, %v1966_v31, 0.0 }
 0x247   : > { %937 = vadd.xlane.f32.xlu0 %v936_v32  ;;  %v1955_v32 = vld [vmem:[%s2335_s17 + $0x18] sm:$0xff]  }
 0x25d   : > { %1169 = vperm.xlu0 %1943, %v1166_v21  }
 0x2d0   : > { %v938_v39 = vpop.xlane.xlu0 %937 }
 0x2d1   : > { %1967 = vrcp.f32 %v938_v39 }
 0x2de   : > { %v1968_v40 = vpop.eup %1967 }
 0x2df   : > { %v940_v41 = vmul.f32 %v1968_v40, %v1966_v31 }
 0x2e1   : > { %v941_v42 = vpack.c.bf16 %v940_v41, %v940_v41 }
 0x2e3   : > { %1889 = vmatmul.mubr.msk.bf16.vlgmr.msra.gmra.mxu0 %vm943_vm4, %v941_v42 }
 0x2e4   : > { %1902 = vmatprep.mubr.msk.bf16.mxu0 %vm1988_vm0, %v1987_v1  ;;  %1899 = vmatpush3.bf16.msra.mxu0 %v1951_v2 }
 0x2e5   : > { %1900 = vmatprep.subr.bf16.mxu0 %v1987_v1 }
 0x2e8   : > { %1901 = vmatpush3.bf16.msra.mxu0 %v1952_v3 }
 0x2e9   : > { %1230 = vmatprep.subr.bf16.mxu0 %v1165_v24 }
 0x3a3   : > { %v985_v43 = vpop.f32.mrf.mxu0 }
 0x3a4   : > { %v991_v44 = vadd.f32 %v985_v43, %v2141_v6  ;;  %v1154_v6 = vld [vmem:[%s2192_s25] sm:$0xff] }
 0x3a5   : > { %v1890_v45 = vpop.f32.mrf.mxu0  ;;  %v1162_v10 = vpack.c.bf16 %v1158_v8, %v1154_v6 }
 0x3a6   : > { %v995_v46 = vsel %vm994_vm5, %v991_v44, 0.0  ;;  %v1954_v45 = vld [vmem:[%s2336_s18] sm:$0xff]  }
 0x3a7   : > { %996 = vadd.xlane.f32.xlu1 %v995_v46  ;;  %v988_v47 = vpop.f32.mrf.mxu0 }
 0x3a8   : > { %v1957_v47 = vld [vmem:[%s2335_s17 + $0x8] sm:$0xff]  }
 0x3a9   : > { %v1891_v48 = vpop.f32.mrf.mxu0 }
 0x3aa   : > { %v1958_v48 = vld [vmem:[%s2335_s17] sm:$0xff]  }
 0x430   : > { %v997_v49 = vpop.xlane.xlu1 %996 }
 0x431   : > { %v999_v50 = vmul.f32 0.0625, %v997_v49  ;;  %v1961_v49 = vld [vmem:[%s2338_s20 + $0x4] ss:$16 sps:$4 sm:$0xff]  }
 0x433   : > { %v1000_v51 = vsub.f32 %v991_v44, %v999_v50  ;;  %v1964_v50 = vld [vmem:[%s2338_s20 + $0xc] ss:$16 sps:$4 sm:$0xff]  }
 0x435   : > { %v1001_v52 = vmul.f32 %v1000_v51, %v1000_v51 }
 0x437   : > { %v1002_v53 = vsel %vm994_vm5, %v1001_v52, 0.0 }
 0x438   : > { %1003 = vadd.xlane.f32.xlu1 %v1002_v53 }
 0x4c1   : > { %v1004_v55 = vpop.xlane.xlu1 %1003 }
 0x4c2   : > { %v1005_v56 = vmul.f32 0.0625, %v1004_v55 }
 0x4c4   : > { %v1006_v57 = vadd.f32 1e-06, %v1005_v56  ;;  %v1353_v56 = vld [vmem:[%s2334_s16] sm:$0xf] }
 0x4c6   : > { %1969 = vrsqrt.f32 %v1006_v57 }
 0x4d3   : > { %v1970_v58 = vpop.eup %1969 }
 0x4d4   : > { %v1008_v60 = vmul.f32 %v1970_v58, %v1000_v51  ;;  %v1959_v51 = vld [vmem:[%s2338_s20] ss:$16 sps:$4 sm:$0xff]  }
 0x4d6   : > { %v1015_v62 = vmul.f32 %v1807_v59, %v1008_v60 }
 0x4d8   : > { %v2176_v63 = vadd.f32 %v1808_v61, %v1015_v62  ;;  %v1962_v61 = vld [vmem:[%s2338_s20 + $0x8] ss:$16 sps:$4 sm:$0xff]  }
 0x4da   : > { %v1023_v0 = vpack.c.bf16 %v2176_v63, %v2176_v63 }
 0x4dc   : > { %1895 = vmatmul.mubr.msk.bf16.vlgmr.msra.gmra.mxu1 %vm732_vm1, %v1023_v0  ;;  %v1487_v0 = vld [vmem:[%s2337_s19] sm:$0x1] }
 0x4dd   : > { %1207 = vmatprep.mubr.bf16.mxu1 %v1989_v9  ;;  %1190 = vmatpush1.bf16.msra.mxu1 %v1162_v10  ;;  %v1990_v10 = vmov 1  }
 0x4de   : > { %1906 = vmatprep.subr.bf16.mxu1 %v1987_v1  ;;  %1946 = vset.pattern.permute.xlu0 %v1990_v10 }
 0x4e4   : > { %1816 = vmatmul.mubr.msk.bf16.vlgmr.msra.gmra.mxu1 %vm732_vm1, %v1153_v11 }
 0x4e5   : > { %1908 = vmatprep.mubr.msk.bf16.mxu1 %vm1988_vm0, %v1987_v1  ;;  %1907 = vmatpush3.bf16.msra.mxu1 %v1953_v20 }
 0x4e6   : > { %1924 = vmatprep.subr.bf16.mxu1 %v1987_v1 }
 0x59c   : > { %v1076_v13 = vpop.f32.mrf.mxu1 }
 0x59d   : > { %v1077_v14 = vadd.f32 %v1809_v12, %v1076_v13 }
 0x59e   : > { %v1896_v15 = vpop.f32.mrf.mxu1 }
 0x59f   : > { %v1082_v16 = vmax.f32 %v1077_v14, 0.0  ;;  %v1991_v15 = vmov 1966171168  }
 0x5a0   : > { %v1079_v17 = vpop.f32.mrf.mxu1 }
 0x5a1   : > { %v1083_v18 = vpack.c.bf16 %v1082_v16, %v1082_v16  ;;  %v1680_v16 = vunpack.c.l.s4 %v1991_v15 }
 0x5a2   : > { %v1897_v19 = vpop.f32.mrf.mxu1 }
 0x5a3   : > { %1903 = vmatmul.mubr.msk.bf16.vlgmr.msra.gmra.mxu0 %vm1100_vm6, %v1083_v18  ;;  %v1542_v19 = vld [vmem:[%s2339_s21] sm:$0xf]  ;;  %v1681_v23 = vunpack.c.0.s8 %v1680_v16 }
 0x5a4   : > { %1248 = vmatprep.mubr.bf16.mxu0 %v1989_v9  ;;  %1231 = vmatpush1.bf16.msra.mxu0 %v1164_v27  ;;  %v2223_v28 = vpop.f32.mrf.mxu1 }
 0x5a5   : > { %1912 = vmatprep.subr.bf16.mxu0 %v1987_v1 }
 0x5a6   : > { %v2229_v29 = vpop.f32.mrf.mxu1 }
 0x5a8   : > { %v1213_v30 = vpop.f32.mrf.mxu1 }
 0x5aa   : > { %v1214_v31 = vpop.f32.mrf.mxu1 }
 0x5ab   : > { %1817 = vmatmul.mubr.msk.bf16.vlgmr.msra.gmra.mxu0 %vm732_vm1, %v1153_v11  ;;  %v1437_v11 = vlaneseq }
 0x5ac   : > { %1920 = vmatprep.mubr.msk.bf16.mxu0 %vm1988_vm0, %v1987_v1  ;;  %1913 = vmatpush3.bf16.msra.mxu0 %v1955_v32 }
 0x5ad   : > { %1914 = vmatprep.subr.bf16.mxu0 %v1987_v1  ;;  %v1438_v13 = vshrl.u32 %v1437_v11, 7  ;;  %vm1704_vm8 = vcmp.lt.s32.totalorder %v1437_v11, 512 }
 0x5af   : > { %v1578_v17 = vsub.s32 3, %v1438_v13  ;;  %v2286_v20 = vsub.s32 0, %v1438_v13  ;;  %v2288_v21 = vsub.s32 1, %v1438_v13 }
 0x5b0   : > { %1915 = vmatpush3.bf16.msra.mxu0 %v1956_v33  ;;  %v1684_v33 = vsub.s32 %v1681_v23, %v1438_v13 }
 0x5b1   : > { %1916 = vmatprep.subr.bf16.mxu0 %v1987_v1  ;;  %v1567_v24 = vrot.slane %v1542_v19, %v2286_v20  ;;  %v1571_v26 = vrot.slane %v1542_v19, %v2288_v21  ;;  %v1579_v27 = vrot.slane %v1542_v19, %v1578_v17 }
 0x5b4   : > { %1917 = vmatpush3.bf16.msra.mxu0 %v1957_v47 }
 0x5b5   : > { %1918 = vmatprep.subr.bf16.mxu0 %v1987_v1 }
 0x5b8   : > { %1919 = vmatpush3.bf16.msra.mxu0 %v1958_v48 }
 0x5b9   : > { %1642 = vmatprep.subr.bf16.mxu0 %v1964_v50 }
 0x663   : > { %v1138_v34 = vpop.f32.mrf.mxu0 }
 0x664   : > { %v1144_v36 = vadd.f32 %v1138_v34, %v2176_v63 }
 0x665   : > { %v1904_v37 = vpop.f32.mrf.mxu0 }
 0x666   : > { %v1152_v38 = vadd.f32 %v1815_v35, %v1144_v36 }
 0x667   : > { %v1141_v39 = vpop.f32.mrf.mxu0 }
 0x668   : > { %v1293_v40 = vpack.c.bf16 %v1152_v38, %v1152_v38 }
 0x669   : > { %v1905_v41 = vpop.f32.mrf.mxu0 }
 0x66a   : > { %v1299_v42 = vshll.u32 %v1293_v40, 16  ;;  %v1297_v43 = vshrl.u32 %v1293_v40, 16 }
 0x66c   : > { %v1301_v44 = vrot.slane %v1299_v42, 1 }
 0x66e   : > { %v1302_v46 = vor.u32 %v1301_v44, %v1297_v43 }
 0x670   : > { %1909 = vmatmul.mubr.msk.bf16.vlgmr.msra.gmra.mxu1 %vm732_vm1, %v1302_v46 }
 0x671   : > { %1925 = vmatpush3.bf16.msra.mxu1 %v1954_v45  ;;  %1926 = vmatprep.mubr.msk.bf16.mxu1 %vm1988_vm0, %v1987_v1  ;;  %v2267_v1 = vpop.f32.mrf.mxu0 }
 0x672   : > { %1601 = vmatprep.subr.bf16.mxu1 %v1961_v49  ;;  %v1170_v49 = vpop.permute.xlu0 %1169 }
 0x673   : > { %v2269_v52 = vpop.f32.mrf.mxu0  ;;  %v1210_v50 = vadd.f32 %v2223_v28, %v1170_v49 }
 0x675   : > { %v1254_v53 = vpop.f32.mrf.mxu0 }
 0x676   : > { %v1251_v53 = vadd.f32 %v2267_v1, %v1170_v49 }
 0x677   : > { %v1255_v54 = vpop.f32.mrf.mxu0 }
 0x678   : > { %1927 = vmatmul.mubr.msk.bf16.vlgmr.msra.gmra.mxu1 %vm732_vm1, %v1293_v40  ;;  %v1253_v54 = vadd.f32 %v2269_v52, %v1170_v49 }
 0x679   : > { %1619 = vmatprep.mubr.bf16.mxu1 %v1989_v9  ;;  %1602 = vmatpush1.bf16.msra.mxu1 %v1959_v51  ;;  %v1212_v51 = vadd.f32 %v2229_v29, %v1170_v49 }
 0x730   : > { %v1346_v55 = vpop.f32.mrf.mxu1 }
 0x731   : > { %v1352_v57 = vmax.f32 %v1346_v55, 0.0  ;;  %v1257_v55 = vmul.f32 %v1210_v50, %v1210_v50 }
 0x732   : > { %v1910_v58 = vpop.f32.mrf.mxu1 }
 0x733   : > { %v1354_v59 = vmul.f32 %v1353_v56, %v1352_v57  ;;  %v1258_v56 = vmul.f32 %v1212_v51, %v1212_v51  ;;  %v1259_v57 = vmul.f32 %v1251_v53, %v1251_v53  ;;  %v1260_v58 = vmul.f32 %v1253_v54, %v1253_v54 }
 0x734   : > { %v1349_v60 = vpop.f32.mrf.mxu1 }
 0x735   : > { %v1355_v62 = vpack.c.bf16 %v1354_v59, %v1354_v59  ;;  %v1261_v59 = vmul.f32 %v1257_v55, %v1210_v50  ;;  %v1262_v60 = vmul.f32 %v1258_v56, %v1212_v51 }
 0x736   : > { %v1911_v63 = vpop.f32.mrf.mxu1 }
 0x737   : > { %1921 = vmatmul.mubr.msk.bf16.vlgmr.msra.gmra.mxu0 %vm1388_vm7, %v1355_v62  ;;  %v1264_v62 = vmul.f32 %v1260_v58, %v1253_v54  ;;  %v1265_v63 = vmul.f32 0.044715, %v1261_v59 }
 0x738   : > { %v1530_v2 = vpop.f32.mrf.mxu1  ;;  %1643 = vmatpush1.bf16.msra.mxu0 %v1962_v61  ;;  %1660 = vmatprep.mubr.bf16.mxu0 %v1989_v9  ;;  %v1574_v9 = vsub.s32 2, %v1438_v13  ;;  %v1263_v61 = vmul.f32 %v1259_v57, %v1251_v53 }
 0x739   : > { %v1531_v3 = vadd.f32 %v1530_v2, %v1487_v0  ;;  %v1266_v0 = vmul.f32 0.044715, %v1262_v60 }
 0x73a   : > { %v1928_v4 = vpop.f32.mrf.mxu1  ;;  %v1575_v25 = vrot.slane %v1542_v19, %v1574_v9  ;;  %v1267_v2 = vmul.f32 0.044715, %v1263_v61 }
 0x73b   : > { %v1536_v5 = vmax.f32 %v1531_v3, 0.0  ;;  %v1268_v3 = vmul.f32 0.044715, %v1264_v62  ;;  %v1269_v4 = vadd.f32 %v1265_v63, %v1210_v50  ;;  %v1270_v28 = vadd.f32 %v1266_v0, %v1212_v51 }
 0x73c   : > { %v1533_v6 = vpop.f32.mrf.mxu1 }
 0x73d   : > { %v1537_v7 = vpack.c.bf16 %v1536_v5, %v1536_v5  ;;  %v1271_v5 = vadd.f32 %v1267_v2, %v1251_v53  ;;  %v1272_v29 = vadd.f32 %v1268_v3, %v1253_v54  ;;  %v1273_v6 = vmul.f32 0.7978846, %v1269_v4 }
 0x73e   : > { %v1929_v8 = vpop.f32.mrf.mxu1  ;;  %v1274_v1 = vmul.f32 0.7978846, %v1270_v28 }
 0x73f   : > { %1831 = vmatmul.mubr.msk.bf16.vlgmr.msra.gmra.mxu1 %vm732_vm1, %v1537_v7  ;;  %1832 = vmatmul.mubr.msk.bf16.vlgmr.msra.gmra.mxu0 %vm732_vm1, %v1537_v7  ;;  %v1275_v7 = vmul.f32 0.7978846, %v1271_v5  ;;  %v1276_v52 = vmul.f32 0.7978846, %v1272_v29  ;;  %1971 = vtanh.f32 %v1273_v6 }
 0x740   : > { %1973 = vtanh.f32 %v1274_v1 }
 0x741   : > { %1975 = vtanh.f32 %v1275_v7 }
 0x742   : > { %1977 = vtanh.f32 %v1276_v52 }
 0x74c   : > { %v1972_v8 = vpop.eup %1971 }
 0x74d   : > { %v1281_v16 = vadd.f32 1.0, %v1972_v8 }
 0x74f   : > { %v1285_v19 = vmul.f32 0.5, %v1281_v16 }
 0x7f7   : > { %v1426_v12 = vpop.f32.mrf.mxu0 }
 0x7f8   : > { %1434 = vperm.xlu1 %1944, %v1426_v12  }
 0x7f9   : > { %v1922_v14 = vpop.f32.mrf.mxu0 }
 0x7fb   : > { %v1429_v18 = vpop.f32.mrf.mxu0 }
 0x7fc   : > { %1945 = vset.pattern.permute.xlu1 %v1990_v10  ;;  %v1974_v10 = vpop.eup %1973 }
 0x7fd   : > { %1458 = vperm.xlu1 %1945, %v1426_v12   ;;  %v1923_v22 = vpop.f32.mrf.mxu0  ;;  %v1976_v11 = vpop.eup %1975  ;;  %v1282_v13 = vadd.f32 1.0, %v1974_v10 }
 0x7fe   : > { %v1978_v12 = vpop.eup %1977  ;;  %v1283_v14 = vadd.f32 1.0, %v1976_v11 }
 0x7ff   : > { %v1621_v30 = vpop.f32.mrf.mxu1  ;;  %v1662_v31 = vpop.f32.mrf.mxu0  ;;  %v1284_v15 = vadd.f32 1.0, %v1978_v12  ;;  %v1286_v9 = vmul.f32 0.5, %v1282_v13 }
 0x800   : > { %v1622_v35 = vadd.f32 %v1621_v30, %v1567_v24  ;;  %v1663_v36 = vadd.f32 %v1662_v31, %v1575_v25  ;;  %v1287_v17 = vmul.f32 0.5, %v1283_v14  ;;  %v1289_v25 = vmul.f32 %v1285_v19, %v1210_v50 }
 0x801   : > { %v1623_v32 = vpop.f32.mrf.mxu1  ;;  %v1664_v34 = vpop.f32.mrf.mxu0  ;;  %v1288_v18 = vmul.f32 0.5, %v1284_v15  ;;  %v1290_v22 = vmul.f32 %v1286_v9, %v1212_v51 }
 0x802   : > { %v1624_v37 = vadd.f32 %v1623_v32, %v1571_v26  ;;  %v1665_v38 = vadd.f32 %v1664_v34, %v1579_v27  ;;  %v1291_v23 = vmul.f32 %v1287_v17, %v1251_v53  ;;  %v1440_v27 = vrot.slane %v1289_v25, %v2286_v20 }
 0x803   : > { %v1625_v39 = vpop.f32.mrf.mxu1  ;;  %v1666_v40 = vpop.f32.mrf.mxu0  ;;  %v1292_v24 = vmul.f32 %v1288_v18, %v1253_v54  ;;  %v1444_v30 = vrot.slane %v1290_v22, %v2286_v20  ;;  %v1468_v34 = vrot.slane %v1290_v22, %v2288_v21 }
 0x804   : > { %v1677_v41 = vcombine.low %v1622_v35, %v1624_v37  ;;  %v1678_v42 = vcombine.low %v1663_v36, %v1665_v38  ;;  %v1448_v31 = vrot.slane %v1291_v23, %v2286_v20  ;;  %v1472_v35 = vrot.slane %v1291_v23, %v2288_v21 }
 0x805   : > { %v1626_v43 = vpop.f32.mrf.mxu1  ;;  %v1667_v44 = vpop.f32.mrf.mxu0  ;;  %v1452_v32 = vrot.slane %v1292_v24, %v2286_v20  ;;  %v1476_v36 = vrot.slane %v1292_v24, %v2288_v21 }
 0x806   : > { %v1685_v45 = vrot.slane %v1677_v41, %v1684_v33  ;;  %v1692_v46 = vrot.slane %v1678_v42, %v1684_v33 }
 0x808   : > { %v1693_v47 = vcombine.low %v1685_v45, %v1692_v46 }
 0x80a   : > { %v1700_v48 = vrot.slane %v1693_v47, %v1684_v33  ;;  %v1464_v33 = vrot.slane %v1289_v25, %v2288_v21 }
 0x80c   : > { %1833 = vst.msk [vmem:[%s2296_s6 + $0x4] ss:$8 sm:$0xf] %vm1704_vm8, %v1700_v48 }
 0x873   : > { %v1435_v26 = vpop.permute.xlu1 %1434 }
 0x874   : > { %v1453_v37 = vmul.f32 %v1440_v27, %v1435_v26  ;;  %v1454_v38 = vmul.f32 %v1444_v30, %v1435_v26  ;;  %v1455_v39 = vmul.f32 %v1448_v31, %v1435_v26  ;;  %v1456_v40 = vmul.f32 %v1452_v32, %v1435_v26 }
 0x878   : > { %v1459_v41 = vpop.permute.xlu1 %1458 }
 0x879   : > { %v1477_v42 = vmul.f32 %v1464_v33, %v1459_v41  ;;  %v1478_v43 = vmul.f32 %v1468_v34, %v1459_v41  ;;  %v1479_v20 = vmul.f32 %v1472_v35, %v1459_v41  ;;  %v1480_v44 = vmul.f32 %v1476_v36, %v1459_v41 }
 0x87b   : > { %v1481_v45 = vadd.f32 %v1477_v42, %v1453_v37  ;;  %v1482_v46 = vadd.f32 %v1478_v43, %v1454_v38  ;;  %v1483_v47 = vadd.f32 %v1479_v20, %v1455_v39  ;;  %v1484_v48 = vadd.f32 %v1480_v44, %v1456_v40 }
 0x87d   : > { %1669 = vst [vmem:[%s2296_s6] sm:$0xf] %v1481_v45  ;;  %1670 = vst [vmem:[%s2296_s6 + $0x8] sm:$0xf] %v1482_v46 }
 0x87e   : > { %1671 = vst [vmem:[%s2296_s6 + $0x10] sm:$0xf] %v1483_v47  ;;  %1672 = vst [vmem:[%s2296_s6 + $0x18] sm:$0xf] %v1484_v48 }
 0x87f PF: > { %s32_s3 = sadd.s32 1, %s1985_s3  }
 0x880   : > { %p29_p4 = scmp.ge.s32.totalorder %s32_s3, 4  }
 0x882   :  { %31 = sbr.rel (!%p29_p4) target bundleno = 8 (0x8), region = 145 }

</bundles_post_ra>
